<compile_context>
chip_gen: v5e
topology: v5e:2x2
jax: 0.10.0
libtpu: 0.0.40
codegen_flags: <defaults>
</compile_context>

<pallas_src>
import functools

import jax
import jax.numpy as jnp
from jax.experimental import pallas as pl
from jax.experimental.pallas import tpu as pltpu

NUM_LAYERS = 4   # matches the PyTorch default num_layers=4
LANE = 128       # TPU lane width


def _round_up(v, m):
    return ((v + m - 1) // m) * m


def _cdiv(a, b):
    return -(-a // b)


def _mlp_kernel(n_linear, precision, *refs):
    # refs = (x, w0, b0, w1, b1, ..., w_{n-1}, b_{n-1}, out)
    x_ref = refs[0]
    out_ref = refs[-1]
    wb = refs[1:-1]

    h = x_ref[...]                                   # f32 (tm, input_size)
    for li in range(n_linear):
        w = wb[2 * li][...]                          # bf16 or f32
        b = wb[2 * li + 1][...]                      # f32
        h = jnp.dot(h.astype(w.dtype), w,
                    preferred_element_type=jnp.float32,
                    precision=precision) + b         # f32 accumulate + f32 bias
        if li < n_linear - 1:                        # ReLU on all but final Linear
            h = jnp.maximum(h, 0.0)
    out_ref[...] = h.astype(out_ref.dtype)


def init_params(key, input_size, latent_size, output_size, num_layers=NUM_LAYERS):
    """PyTorch-style init: U(-1/sqrt(fan_in), 1/sqrt(fan_in)); W stored [in, out]."""
    params = []
    dims = [(input_size, latent_size)]
    dims += [(latent_size, latent_size)] * num_layers
    dims += [(latent_size, output_size)]
    for fan_in, fan_out in dims:
        key, kw, kb = jax.random.split(key, 3)
        bound = 1.0 / jnp.sqrt(jnp.float32(fan_in))
        w = jax.random.uniform(kw, (fan_in, fan_out), jnp.float32, -bound, bound)
        b = jax.random.uniform(kb, (1, fan_out), jnp.float32, -bound, bound)
        params.append((w, b))
    return params


@functools.partial(jax.jit, static_argnames=("input_size", "tile_m", "use_bf16"))
def intrinsic_target_forward(x, params, *, input_size, tile_m=2048, use_bf16=True):
    """x: [batch, num_atoms, 3] float32 -> [batch, output_size] float32."""
    x2d = x.reshape(-1, input_size).astype(jnp.float32)
    batch = x2d.shape[0]
    latent_size = params[0][0].shape[1]
    output_size = params[-1][0].shape[1]
    n_linear = len(params)

    # ---- pad only the latent feature dims to 128 lanes (zeros => exact math) ----
    lat_p = _round_up(latent_size, LANE)
    w_dtype = jnp.bfloat16 if use_bf16 else jnp.float32
    padded_params = []
    for li, (w, b) in enumerate(params):
        fin_p = w.shape[0] if li == 0 else lat_p            # raw input_size on layer 0
        fout_p = output_size if li == n_linear - 1 else lat_p  # raw output_size on last
        w_p = jnp.pad(w, ((0, fin_p - w.shape[0]), (0, fout_p - w.shape[1])))
        b_p = jnp.pad(b, ((0, 0), (0, fout_p - b.shape[1])))
        padded_params.append((w_p.astype(w_dtype), b_p.astype(jnp.float32)))

    # ---- balanced batch tiling: tm multiple of 8, >=2 grid steps for v7x ----
    tile_m = max(8, _round_up(tile_m, 8))
    n_tiles = _cdiv(batch, tile_m)
    if batch > 8:
        n_tiles = max(n_tiles, 2)        # let v7x's two TensorCores split the batch
    tm = _round_up(_cdiv(batch, n_tiles), 8)
    batch_p = _round_up(batch, tm)
    if batch_p != batch:
        x2d = jnp.pad(x2d, ((0, batch_p - batch), (0, 0)))   # rows only, no lane pad

    precision = (jax.lax.Precision.DEFAULT if use_bf16
                 else jax.lax.Precision.HIGHEST)

    flat_args = [x2d]
    in_specs = [pl.BlockSpec((tm, input_size), lambda i: (i, 0))]
    for w, b in padded_params:
        flat_args += [w, b]
        # constant index_map -> weights/biases stay resident in VMEM across steps
        in_specs += [
            pl.BlockSpec(w.shape, lambda i: (0, 0)),
            pl.BlockSpec(b.shape, lambda i: (0, 0)),
        ]

    flops = 2 * batch_p * sum(w.shape[0] * w.shape[1] for w, _ in padded_params)
    bytes_accessed = (
        x2d.size * 4
        + batch_p * output_size * 4
        + sum(w.size * w.dtype.itemsize + b.size * 4 for w, b in padded_params)
    )

    out = pl.pallas_call(
        functools.partial(_mlp_kernel, n_linear, precision),
        out_shape=jax.ShapeDtypeStruct((batch_p, output_size), jnp.float32),
        grid=(batch_p // tm,),
        in_specs=in_specs,
        out_specs=pl.BlockSpec((tm, output_size), lambda i: (i, 0)),
        compiler_params=pltpu.CompilerParams(
            dimension_semantics=("parallel",),
        ),
        cost_estimate=pl.CostEstimate(
            flops=flops, transcendentals=0, bytes_accessed=bytes_accessed
        ),
    )(*flat_args)

    return out[:batch] if batch_p != batch else out


def _reference_forward(x, params, input_size):
    h = x.reshape(-1, input_size).astype(jnp.float32)
    for i, (w, b) in enumerate(params):
        h = jnp.dot(h, w, precision=jax.lax.Precision.HIGHEST) + b
        if i < len(params) - 1:
            h = jnp.maximum(h, 0.0)
    return h


if __name__ == "__main__":
    # Small shapes consistent with the module: input_size = num_atoms * 3
    batch = 8
    num_atoms = 8
    input_size = num_atoms * 3      # 24
    latent_size = 32
    output_size = 1

    key = jax.random.PRNGKey(0)
    key, kx = jax.random.split(key)
    x = jax.random.normal(kx, (batch, num_atoms, 3), jnp.float32)
    params = init_params(key, input_size, latent_size, output_size, NUM_LAYERS)
    ref = _reference_forward(x, params, input_size)

    # Strict f32 path (Precision.HIGHEST in-kernel).
    out32 = jax.block_until_ready(
        intrinsic_target_forward(x, params, input_size=input_size, use_bf16=False))
    assert out32.shape == (batch, output_size), out32.shape
    assert jnp.allclose(out32, ref, atol=1e-5, rtol=1e-5), "f32 mismatch (small batch)"

    # Default bf16-operand / f32-accumulate path.
    outbf = jax.block_until_ready(
        intrinsic_target_forward(x, params, input_size=input_size))
    assert outbf.shape == (batch, output_size), outbf.shape
    assert jnp.allclose(outbf, ref, atol=2e-2, rtol=5e-2), "bf16 mismatch (small batch)"

    # Multi-tile grid + ragged batch tail (exercises balanced tiling & batch pad).
    key, kx2 = jax.random.split(key)
    big_batch = 600
    x_big = jax.random.normal(kx2, (big_batch, num_atoms, 3), jnp.float32)
    ref_big = _reference_forward(x_big, params, input_size)

    out_big32 = jax.block_until_ready(
        intrinsic_target_forward(x_big, params, input_size=input_size,
                                 tile_m=256, use_bf16=False))
    assert out_big32.shape == (big_batch, output_size), out_big32.shape
    assert jnp.allclose(out_big32, ref_big, atol=1e-4, rtol=1e-5), "f32 mismatch (big batch)"

    out_bigbf = jax.block_until_ready(
        intrinsic_target_forward(x_big, params, input_size=input_size))
    assert out_bigbf.shape == (big_batch, output_size), out_bigbf.shape
    assert jnp.allclose(out_bigbf, ref_big, atol=2e-2, rtol=5e-2), "bf16 mismatch (big batch)"

    # TODO(synk): .detach() has no kernel-side meaning (inference forward only).
    print("KERNEL_OK")
</pallas_src>

<mosaic_0001>
module attributes {stable_mosaic.version = 11 : i64} {
  func.func @_mlp_kernel(%arg0: i32, %arg1: memref<8x24xf32, #tpu.memory_space<vmem>>, %arg2: memref<24x128xf32, #tpu.memory_space<vmem>>, %arg3: memref<1x128xf32, #tpu.memory_space<vmem>>, %arg4: memref<128x128xf32, #tpu.memory_space<vmem>>, %arg5: memref<1x128xf32, #tpu.memory_space<vmem>>, %arg6: memref<128x128xf32, #tpu.memory_space<vmem>>, %arg7: memref<1x128xf32, #tpu.memory_space<vmem>>, %arg8: memref<128x128xf32, #tpu.memory_space<vmem>>, %arg9: memref<1x128xf32, #tpu.memory_space<vmem>>, %arg10: memref<128x128xf32, #tpu.memory_space<vmem>>, %arg11: memref<1x128xf32, #tpu.memory_space<vmem>>, %arg12: memref<128x1xf32, #tpu.memory_space<vmem>>, %arg13: memref<1x1xf32, #tpu.memory_space<vmem>>, %arg14: memref<8x1xf32, #tpu.memory_space<vmem>>) attributes {dimension_semantics = [#tpu.dimension_semantics<parallel>], iteration_bounds = array<i64: 1>, scalar_prefetch = 0 : i64, scratch_operands = 0 : i64, tpu.core_type = #tpu.core_type<tc>, window_params = [{transform_indices = @transform_0, window_bounds = array<i64: 8, 24>}, {pipeline_mode = #tpu.pipeline_mode<synchronous>, transform_indices = @transform_1, window_bounds = array<i64: 24, 128>}, {pipeline_mode = #tpu.pipeline_mode<synchronous>, transform_indices = @transform_2, window_bounds = array<i64: 1, 128>}, {pipeline_mode = #tpu.pipeline_mode<synchronous>, transform_indices = @transform_3, window_bounds = array<i64: 128, 128>}, {pipeline_mode = #tpu.pipeline_mode<synchronous>, transform_indices = @transform_4, window_bounds = array<i64: 1, 128>}, {pipeline_mode = #tpu.pipeline_mode<synchronous>, transform_indices = @transform_5, window_bounds = array<i64: 128, 128>}, {pipeline_mode = #tpu.pipeline_mode<synchronous>, transform_indices = @transform_6, window_bounds = array<i64: 1, 128>}, {pipeline_mode = #tpu.pipeline_mode<synchronous>, transform_indices = @transform_7, window_bounds = array<i64: 128, 128>}, {pipeline_mode = #tpu.pipeline_mode<synchronous>, transform_indices = @transform_8, window_bounds = array<i64: 1, 128>}, {pipeline_mode = #tpu.pipeline_mode<synchronous>, transform_indices = @transform_9, window_bounds = array<i64: 128, 128>}, {pipeline_mode = #tpu.pipeline_mode<synchronous>, transform_indices = @transform_10, window_bounds = array<i64: 1, 128>}, {pipeline_mode = #tpu.pipeline_mode<synchronous>, transform_indices = @transform_11, window_bounds = array<i64: 128, 1>}, {pipeline_mode = #tpu.pipeline_mode<synchronous>, transform_indices = @transform_12, window_bounds = array<i64: 1, 1>}, {transform_indices = @transform_13, window_bounds = array<i64: 8, 1>}]} {
    %c0 = arith.constant 0 : index
    %c0_0 = arith.constant 0 : index
    %0 = vector.load %arg1[%c0, %c0_0] : memref<8x24xf32, #tpu.memory_space<vmem>>, vector<8x24xf32>
    %c0_1 = arith.constant 0 : index
    %c0_2 = arith.constant 0 : index
    %1 = vector.load %arg2[%c0_1, %c0_2] : memref<24x128xf32, #tpu.memory_space<vmem>>, vector<24x128xf32>
    %c0_3 = arith.constant 0 : index
    %c0_4 = arith.constant 0 : index
    %2 = vector.load %arg3[%c0_3, %c0_4] : memref<1x128xf32, #tpu.memory_space<vmem>>, vector<1x128xf32>
    %cst = arith.constant dense<0.000000e+00> : vector<8x128xf32>
    %3 = tpu.matmul %0, %1, %cst {dimension_numbers = #tpu.dot_dimension_numbers<[1], [0], [0], [1], [0, 0, 1, 1], [], []>, precision = #tpu.contract_precision<fp32>} : vector<8x24xf32>, vector<24x128xf32>, vector<8x128xf32> -> vector<8x128xf32>
    %4 = vector.broadcast %2 : vector<1x128xf32> to vector<8x128xf32>
    %5 = arith.addf %3, %4 : vector<8x128xf32>
    %cst_5 = arith.constant 0.000000e+00 : f32
    %6 = vector.broadcast %cst_5 : f32 to vector<8x128xf32>
    %7 = arith.maximumf %5, %6 : vector<8x128xf32>
    %c0_6 = arith.constant 0 : index
    %c0_7 = arith.constant 0 : index
    %8 = vector.load %arg4[%c0_6, %c0_7] : memref<128x128xf32, #tpu.memory_space<vmem>>, vector<128x128xf32>
    %c0_8 = arith.constant 0 : index
    %c0_9 = arith.constant 0 : index
    %9 = vector.load %arg5[%c0_8, %c0_9] : memref<1x128xf32, #tpu.memory_space<vmem>>, vector<1x128xf32>
    %cst_10 = arith.constant dense<0.000000e+00> : vector<8x128xf32>
    %10 = tpu.matmul %7, %8, %cst_10 {dimension_numbers = #tpu.dot_dimension_numbers<[1], [0], [0], [1], [0, 0, 1, 1], [], []>, precision = #tpu.contract_precision<fp32>} : vector<8x128xf32>, vector<128x128xf32>, vector<8x128xf32> -> vector<8x128xf32>
    %11 = vector.broadcast %9 : vector<1x128xf32> to vector<8x128xf32>
    %12 = arith.addf %10, %11 : vector<8x128xf32>
    %cst_11 = arith.constant 0.000000e+00 : f32
    %13 = vector.broadcast %cst_11 : f32 to vector<8x128xf32>
    %14 = arith.maximumf %12, %13 : vector<8x128xf32>
    %c0_12 = arith.constant 0 : index
    %c0_13 = arith.constant 0 : index
    %15 = vector.load %arg6[%c0_12, %c0_13] : memref<128x128xf32, #tpu.memory_space<vmem>>, vector<128x128xf32>
    %c0_14 = arith.constant 0 : index
    %c0_15 = arith.constant 0 : index
    %16 = vector.load %arg7[%c0_14, %c0_15] : memref<1x128xf32, #tpu.memory_space<vmem>>, vector<1x128xf32>
    %cst_16 = arith.constant dense<0.000000e+00> : vector<8x128xf32>
    %17 = tpu.matmul %14, %15, %cst_16 {dimension_numbers = #tpu.dot_dimension_numbers<[1], [0], [0], [1], [0, 0, 1, 1], [], []>, precision = #tpu.contract_precision<fp32>} : vector<8x128xf32>, vector<128x128xf32>, vector<8x128xf32> -> vector<8x128xf32>
    %18 = vector.broadcast %16 : vector<1x128xf32> to vector<8x128xf32>
    %19 = arith.addf %17, %18 : vector<8x128xf32>
    %cst_17 = arith.constant 0.000000e+00 : f32
    %20 = vector.broadcast %cst_17 : f32 to vector<8x128xf32>
    %21 = arith.maximumf %19, %20 : vector<8x128xf32>
    %c0_18 = arith.constant 0 : index
    %c0_19 = arith.constant 0 : index
    %22 = vector.load %arg8[%c0_18, %c0_19] : memref<128x128xf32, #tpu.memory_space<vmem>>, vector<128x128xf32>
    %c0_20 = arith.constant 0 : index
    %c0_21 = arith.constant 0 : index
    %23 = vector.load %arg9[%c0_20, %c0_21] : memref<1x128xf32, #tpu.memory_space<vmem>>, vector<1x128xf32>
    %cst_22 = arith.constant dense<0.000000e+00> : vector<8x128xf32>
    %24 = tpu.matmul %21, %22, %cst_22 {dimension_numbers = #tpu.dot_dimension_numbers<[1], [0], [0], [1], [0, 0, 1, 1], [], []>, precision = #tpu.contract_precision<fp32>} : vector<8x128xf32>, vector<128x128xf32>, vector<8x128xf32> -> vector<8x128xf32>
    %25 = vector.broadcast %23 : vector<1x128xf32> to vector<8x128xf32>
    %26 = arith.addf %24, %25 : vector<8x128xf32>
    %cst_23 = arith.constant 0.000000e+00 : f32
    %27 = vector.broadcast %cst_23 : f32 to vector<8x128xf32>
    %28 = arith.maximumf %26, %27 : vector<8x128xf32>
    %c0_24 = arith.constant 0 : index
    %c0_25 = arith.constant 0 : index
    %29 = vector.load %arg10[%c0_24, %c0_25] : memref<128x128xf32, #tpu.memory_space<vmem>>, vector<128x128xf32>
    %c0_26 = arith.constant 0 : index
    %c0_27 = arith.constant 0 : index
    %30 = vector.load %arg11[%c0_26, %c0_27] : memref<1x128xf32, #tpu.memory_space<vmem>>, vector<1x128xf32>
    %cst_28 = arith.constant dense<0.000000e+00> : vector<8x128xf32>
    %31 = tpu.matmul %28, %29, %cst_28 {dimension_numbers = #tpu.dot_dimension_numbers<[1], [0], [0], [1], [0, 0, 1, 1], [], []>, precision = #tpu.contract_precision<fp32>} : vector<8x128xf32>, vector<128x128xf32>, vector<8x128xf32> -> vector<8x128xf32>
    %32 = vector.broadcast %30 : vector<1x128xf32> to vector<8x128xf32>
    %33 = arith.addf %31, %32 : vector<8x128xf32>
    %cst_29 = arith.constant 0.000000e+00 : f32
    %34 = vector.broadcast %cst_29 : f32 to vector<8x128xf32>
    %35 = arith.maximumf %33, %34 : vector<8x128xf32>
    %c0_30 = arith.constant 0 : index
    %c0_31 = arith.constant 0 : index
    %36 = vector.load %arg12[%c0_30, %c0_31] : memref<128x1xf32, #tpu.memory_space<vmem>>, vector<128x1xf32>
    %c0_32 = arith.constant 0 : index
    %c0_33 = arith.constant 0 : index
    %37 = vector.load %arg13[%c0_32, %c0_33] : memref<1x1xf32, #tpu.memory_space<vmem>>, vector<1x1xf32>
    %cst_34 = arith.constant dense<0.000000e+00> : vector<8x1xf32>
    %38 = tpu.matmul %35, %36, %cst_34 {dimension_numbers = #tpu.dot_dimension_numbers<[1], [0], [0], [1], [0, 0, 1, 1], [], []>, precision = #tpu.contract_precision<fp32>} : vector<8x128xf32>, vector<128x1xf32>, vector<8x1xf32> -> vector<8x1xf32>
    %39 = vector.broadcast %37 : vector<1x1xf32> to vector<8x1xf32>
    %40 = arith.addf %38, %39 : vector<8x1xf32>
    %c0_35 = arith.constant 0 : index
    %c0_36 = arith.constant 0 : index
    %41 = vector.load %arg14[%c0_35, %c0_36] : memref<8x1xf32, #tpu.memory_space<vmem>>, vector<8x1xf32>
    tpu.vector_store %arg14[%c0_35, %c0_36], %40 {strides = array<i32>} : memref<8x1xf32, #tpu.memory_space<vmem>>, vector<8x1xf32>,
    return
  }
  func.func @transform_0(%arg0: i32) -> (i32, i32) {
    %c0_i32 = arith.constant 0 : i32
    %c0_i32_0 = arith.constant 0 : i32
    return %arg0, %c0_i32 : i32, i32
  }
  func.func @transform_1(%arg0: i32) -> (i32, i32) {
    %c0_i32 = arith.constant 0 : i32
    %c0_i32_0 = arith.constant 0 : i32
    %c0_i32_1 = arith.constant 0 : i32
    return %c0_i32, %c0_i32_0 : i32, i32
  }
  func.func @transform_2(%arg0: i32) -> (i32, i32) {
    %c0_i32 = arith.constant 0 : i32
    %c0_i32_0 = arith.constant 0 : i32
    %c0_i32_1 = arith.constant 0 : i32
    return %c0_i32, %c0_i32_0 : i32, i32
  }
  func.func @transform_3(%arg0: i32) -> (i32, i32) {
    %c0_i32 = arith.constant 0 : i32
    %c0_i32_0 = arith.constant 0 : i32
    %c0_i32_1 = arith.constant 0 : i32
    return %c0_i32, %c0_i32_0 : i32, i32
  }
  func.func @transform_4(%arg0: i32) -> (i32, i32) {
    %c0_i32 = arith.constant 0 : i32
    %c0_i32_0 = arith.constant 0 : i32
    %c0_i32_1 = arith.constant 0 : i32
    return %c0_i32, %c0_i32_0 : i32, i32
  }
  func.func @transform_5(%arg0: i32) -> (i32, i32) {
    %c0_i32 = arith.constant 0 : i32
    %c0_i32_0 = arith.constant 0 : i32
    %c0_i32_1 = arith.constant 0 : i32
    return %c0_i32, %c0_i32_0 : i32, i32
  }
  func.func @transform_6(%arg0: i32) -> (i32, i32) {
    %c0_i32 = arith.constant 0 : i32
    %c0_i32_0 = arith.constant 0 : i32
    %c0_i32_1 = arith.constant 0 : i32
    return %c0_i32, %c0_i32_0 : i32, i32
  }
  func.func @transform_7(%arg0: i32) -> (i32, i32) {
    %c0_i32 = arith.constant 0 : i32
    %c0_i32_0 = arith.constant 0 : i32
    %c0_i32_1 = arith.constant 0 : i32
    return %c0_i32, %c0_i32_0 : i32, i32
  }
  func.func @transform_8(%arg0: i32) -> (i32, i32) {
    %c0_i32 = arith.constant 0 : i32
    %c0_i32_0 = arith.constant 0 : i32
    %c0_i32_1 = arith.constant 0 : i32
    return %c0_i32, %c0_i32_0 : i32, i32
  }
  func.func @transform_9(%arg0: i32) -> (i32, i32) {
    %c0_i32 = arith.constant 0 : i32
    %c0_i32_0 = arith.constant 0 : i32
    %c0_i32_1 = arith.constant 0 : i32
    return %c0_i32, %c0_i32_0 : i32, i32
  }
  func.func @transform_10(%arg0: i32) -> (i32, i32) {
    %c0_i32 = arith.constant 0 : i32
    %c0_i32_0 = arith.constant 0 : i32
    %c0_i32_1 = arith.constant 0 : i32
    return %c0_i32, %c0_i32_0 : i32, i32
  }
  func.func @transform_11(%arg0: i32) -> (i32, i32) {
    %c0_i32 = arith.constant 0 : i32
    %c0_i32_0 = arith.constant 0 : i32
    %c0_i32_1 = arith.constant 0 : i32
    return %c0_i32, %c0_i32_0 : i32, i32
  }
  func.func @transform_12(%arg0: i32) -> (i32, i32) {
    %c0_i32 = arith.constant 0 : i32
    %c0_i32_0 = arith.constant 0 : i32
    %c0_i32_1 = arith.constant 0 : i32
    return %c0_i32, %c0_i32_0 : i32, i32
  }
  func.func @transform_13(%arg0: i32) -> (i32, i32) {
    %c0_i32 = arith.constant 0 : i32
    %c0_i32_0 = arith.constant 0 : i32
    return %arg0, %c0_i32 : i32, i32
  }
}

</mosaic_0001>

<bundles_post_ra>
// kernel: intrinsic_target_forward.1
= control target key start
LH: loop header
LB: loop body
LE: loop exit
PB: predicated region body
PF: predicated region fallthrough
CT: control target
= control target key end

     0   :  { %vm54_vm0 = vcmask 195584   ;;  %vm2040_vm1 = vcmask 7168   ;;  %s3513_s1 = inlined_call_operand.vmem [shape: f32[24,128], index: 1, kind: input, shape index: {}]   ;;  %s3514_s0 = inlined_call_operand.vmem [shape: f32[8,24], index: 0, kind: input, shape index: {}]   ;;  %s3515_s3 = inlined_call_operand.vmem [shape: f32[128,128], index: 3, kind: input, shape index: {}]   ;;  %s3516_s2 = inlined_call_operand.vmem [shape: f32[1,128], index: 2, kind: input, shape index: {}]   ;;  %s3517_s5 = inlined_call_operand.vmem [shape: f32[128,128], index: 5, kind: input, shape index: {}]   ;;  %s3518_s4 = inlined_call_operand.vmem [shape: f32[1,128], index: 4, kind: input, shape index: {}]   ;;  %s3519_s7 = inlined_call_operand.vmem [shape: f32[128,128], index: 7, kind: input, shape index: {}]   ;;  %s3520_s6 = inlined_call_operand.vmem [shape: f32[1,128], index: 6, kind: input, shape index: {}]   ;;  %s3521_s9 = inlined_call_operand.vmem [shape: f32[128,128], index: 9, kind: input, shape index: {}]   ;;  %s3522_s8 = inlined_call_operand.vmem [shape: f32[1,128], index: 8, kind: input, shape index: {}]   ;;  %s3523_s11 = inlined_call_operand.vmem [shape: f32[128,1], index: 11, kind: input, shape index: {}]   ;;  %s3524_s10 = inlined_call_operand.vmem [shape: f32[1,128], index: 10, kind: input, shape index: {}]   ;;  %s3525_s12 = inlined_call_operand.<no memory space> [shape: f32[1,1], index: 12, kind: input, shape index: {}]   ;;  %s3526_s13 = inlined_call_operand.vmem [shape: f32[8,1], index: 13, kind: output, shape index: {}]  }
   0x1   :  { %v49_v0 = vld [vmem:[%s3513_s1 + $0x10] sm:$0xff]  ;;  %v48_v1 = vld [vmem:[%s3513_s1 + $0x8] sm:$0xff]  ;;  %v47_v2 = vld [vmem:[%s3513_s1] sm:$0xff] }
   0x2   :  { %v2131_v3 = vand.u32 4294901760, %v49_v0  ;;  %v2133_v4 = vand.u32 4294901760, %v48_v1  ;;  %v2135_v5 = vand.u32 4294901760, %v47_v2  ;;  %v46_v6 = vld [vmem:[%s3514_s0] sm:$0xff]  ;;  %v246_v7 = vld [vmem:[%s3515_s3 + $0x78] sm:$0xff]  ;;  %v245_v8 = vld [vmem:[%s3515_s3 + $0x70] sm:$0xff] }
   0x3   :  { %v56_v9 = vsel %vm54_vm0, %v46_v6, 0  ;;  %v2146_v10 = vand.u32 4294901760, %v246_v7  ;;  %v2148_v11 = vand.u32 4294901760, %v245_v8  ;;  %v244_v12 = vld [vmem:[%s3515_s3 + $0x68] sm:$0xff]  ;;  %v243_v13 = vld [vmem:[%s3515_s3 + $0x60] sm:$0xff]  ;;  %v242_v38 = vld [vmem:[%s3515_s3 + $0x58] sm:$0xff] }
   0x4   :  { %72 = vmatpush.msra.mxu0 %v2131_v3  ;;  %v2158_v14 = vsub.f32 %v49_v0, %v2131_v3  ;;  %v2160_v15 = vand.u32 4294901760, %v56_v9  ;;  %v2163_v16 = vsub.f32 %v48_v1, %v2133_v4  ;;  %v2166_v17 = vsub.f32 %v47_v2, %v2135_v5  ;;  %v241_v39 = vld [vmem:[%s3515_s3 + $0x50] sm:$0xff]  ;;  %v240_v40 = vld [vmem:[%s3515_s3 + $0x48] sm:$0xff]  ;;  %v239_v45 = vld [vmem:[%s3515_s3 + $0x40] sm:$0xff] }
   0x5   :  { %v2169_v18 = vsub.f32 %v246_v7, %v2146_v10  ;;  %v2172_v19 = vsub.f32 %v245_v8, %v2148_v11  ;;  %v2174_v20 = vand.u32 4294901760, %v244_v12  ;;  %v2176_v21 = vand.u32 4294901760, %v243_v13  ;;  %252 = vmatpush.msra.mxu2 %v2146_v10  ;;  %v238_v46 = vld [vmem:[%s3515_s3 + $0x38] sm:$0xff]  ;;  %v237_v51 = vld [vmem:[%s3515_s3 + $0x30] sm:$0xff]  ;;  %v236_v56 = vld [vmem:[%s3515_s3 + $0x28] sm:$0xff] }
   0x6   :  { %74 = vmatpush.msra.mxu0 %v2133_v4  ;;  %v101_v22 = vand.u32 4294901760, %v2158_v14  ;;  %v2182_v23 = vsub.f32 %v56_v9, %v2160_v15  ;;  %v107_v24 = vand.u32 4294901760, %v2163_v16  ;;  %v113_v25 = vand.u32 4294901760, %v2166_v17  ;;  %v235_v0 = vld [vmem:[%s3515_s3 + $0x20] sm:$0xff] }
   0x7   :  { %v294_v26 = vand.u32 4294901760, %v2169_v18  ;;  %v300_v27 = vand.u32 4294901760, %v2172_v19  ;;  %v2189_v28 = vsub.f32 %v244_v12, %v2174_v20  ;;  %v2192_v29 = vsub.f32 %v243_v13, %v2176_v21  ;;  %254 = vmatpush.msra.mxu2 %v2148_v11 }
   0x8   :  { %76 = vmatpush.msra.mxu0 %v2135_v5  ;;  %v102_v30 = vsub.f32 %v2158_v14, %v101_v22  ;;  %v79_v31 = vand.u32 4294901760, %v2182_v23  ;;  %v108_v32 = vsub.f32 %v2163_v16, %v107_v24  ;;  %v114_v33 = vsub.f32 %v2166_v17, %v113_v25 }
   0x9   :  { %v295_v34 = vsub.f32 %v2169_v18, %v294_v26  ;;  %v301_v35 = vsub.f32 %v2172_v19, %v300_v27  ;;  %v306_v36 = vand.u32 4294901760, %v2189_v28  ;;  %v312_v37 = vand.u32 4294901760, %v2192_v29  ;;  %256 = vmatpush.msra.mxu2 %v2174_v20 }
   0xa   :  { %137 = vmatpush.msrb.mxu0 %v2158_v14  ;;  %v103_v41 = vand.u32 4294901760, %v102_v30  ;;  %v80_v42 = vsub.f32 %v2182_v23, %v79_v31  ;;  %v109_v43 = vand.u32 4294901760, %v108_v32  ;;  %v115_v44 = vand.u32 4294901760, %v114_v33 }
   0xb   :  { %v296_v47 = vand.u32 4294901760, %v295_v34  ;;  %v302_v48 = vand.u32 4294901760, %v301_v35  ;;  %v307_v49 = vsub.f32 %v2189_v28, %v306_v36  ;;  %v313_v50 = vsub.f32 %v2192_v29, %v312_v37  ;;  %258 = vmatpush.msra.mxu2 %v2176_v21  ;;  %v234_v34 = vld [vmem:[%s3515_s3 + $0x18] sm:$0xff] }
   0xc   :  { %140 = vmatpush.msrb.mxu0 %v2163_v16  ;;  %104 = vmatpush.msra.mxu1 %v103_v41  ;;  %v81_v52 = vand.u32 4294901760, %v80_v42  ;;  %v2243_v53 = vand.u32 4294901760, %v242_v38  ;;  %v2245_v54 = vand.u32 4294901760, %v241_v39  ;;  %v2247_v55 = vand.u32 4294901760, %v240_v40 }
   0xd   :  { %297 = vmatpush.msra.mxu3 %v296_v47  ;;  %v308_v57 = vand.u32 4294901760, %v307_v49  ;;  %v2253_v58 = vand.u32 4294901760, %v239_v45  ;;  %v2255_v59 = vand.u32 4294901760, %v238_v46  ;;  %v2266_v63 = vand.u32 4294901760, %v237_v51 }
   0xe   :  { %143 = vmatpush.msrb.mxu0 %v2166_v17  ;;  %110 = vmatpush.msra.mxu1 %v109_v43  ;;  %v2258_v60 = vsub.f32 %v242_v38, %v2243_v53  ;;  %v2261_v61 = vsub.f32 %v241_v39, %v2245_v54  ;;  %v2264_v62 = vsub.f32 %v240_v40, %v2247_v55  ;;  %v2277_v6 = vand.u32 4294901760, %v236_v56  ;;  %v233_v17 = vld [vmem:[%s3515_s3 + $0x10] sm:$0xff] }
   0xf   :  { %82 = vmatmul.f32.vlgmr.msra.gmra.mxu0 %v81_v52  ;;  %303 = vmatpush.msra.mxu3 %v302_v48  ;;  %v2272_v1 = vsub.f32 %v239_v45, %v2253_v58  ;;  %v2275_v2 = vsub.f32 %v238_v46, %v2255_v59  ;;  %v314_v7 = vand.u32 4294901760, %v313_v50  ;;  %v2288_v14 = vsub.f32 %v237_v51, %v2266_v63 }
  0x10   :  { %192 = vmatpush.msra.mxu0 %v101_v22  ;;  %116 = vmatpush.msra.mxu1 %v115_v44  ;;  %v318_v8 = vand.u32 4294901760, %v2258_v60  ;;  %v324_v9 = vand.u32 4294901760, %v2261_v61  ;;  %v330_v12 = vand.u32 4294901760, %v2264_v62  ;;  %v2290_v22 = vand.u32 4294901760, %v235_v0 }
  0x11   :  { %260 = vmatpush.msra.mxu2 %v2243_v53  ;;  %118 = vmatmul.f32.vlgmr.msra.gmra.mxu1 %v2160_v15  ;;  %v336_v13 = vand.u32 4294901760, %v2272_v1  ;;  %v2307_v33 = vsub.f32 %v236_v56, %v2277_v6  ;;  %v348_v39 = vand.u32 4294901760, %v2288_v14  ;;  %v2326_v41 = vand.u32 4294901760, %v234_v34 }
  0x12   :  { %196 = vmatpush.msra.mxu0 %v107_v24  ;;  %164 = vmatpush.msrb.mxu1 %v2131_v3  ;;  %v319_v30 = vsub.f32 %v2258_v60, %v318_v8  ;;  %v325_v32 = vsub.f32 %v2261_v61, %v324_v9  ;;  %v331_v16 = vsub.f32 %v2264_v62, %v330_v12  ;;  %v342_v24 = vand.u32 4294901760, %v2275_v2 }
  0x13   :  { %309 = vmatpush.msra.mxu3 %v308_v57  ;;  %262 = vmatpush.msra.mxu2 %v2245_v54  ;;  %v337_v38 = vsub.f32 %v2272_v1, %v336_v13  ;;  %v2322_v40 = vsub.f32 %v235_v0, %v2290_v22  ;;  %v2328_v42 = vand.u32 4294901760, %v233_v17  ;;  %v354_v45 = vand.u32 4294901760, %v2307_v33 }
  0x14   :  { %200 = vmatpush.msra.mxu0 %v113_v25  ;;  %166 = vmatpush.msrb.mxu1 %v2133_v4  ;;  %v320_v25 = vand.u32 4294901760, %v319_v30  ;;  %v326_v35 = vand.u32 4294901760, %v325_v32  ;;  %v332_v43 = vand.u32 4294901760, %v331_v16  ;;  %v343_v44 = vsub.f32 %v2275_v2, %v342_v24  ;;  %v232_v30 = vld [vmem:[%s3515_s3 + $0x8] sm:$0xff]  ;;  %v231_v16 = vld [vmem:[%s3515_s3] sm:$0xff] }
  0x15   :  { %315 = vmatpush.msra.mxu3 %v314_v7  ;;  %264 = vmatpush.msra.mxu2 %v2247_v55  ;;  %v2337_v46 = vsub.f32 %v234_v34, %v2326_v41  ;;  %v349_v47 = vsub.f32 %v2288_v14, %v348_v39  ;;  %v360_v48 = vand.u32 4294901760, %v2322_v40  ;;  %v2347_v49 = vsub.f32 %v233_v17, %v2328_v42 }
  0x16   :  { %168 = vmatpush.msrb.mxu1 %v2135_v5  ;;  %v344_v50 = vand.u32 4294901760, %v343_v44  ;;  %v279_v32 = vand.u32 4294901760, %v232_v30  ;;  %v281_v17 = vand.u32 4294901760, %v231_v16 }
  0x17   :  { %146 = vmatmul.f32.vlgmr.msrb.gmra.mxu0 %v2182_v23  ;;  %321 = vmatpush.msra.mxu3 %v320_v25  ;;  %v355_v23 = vsub.f32 %v2307_v33, %v354_v45  ;;  %v350_v51 = vand.u32 4294901760, %v349_v47  ;;  %v372_v52 = vand.u32 4294901760, %v2347_v49 }
  0x18   :  { %220 = vmatpush.msra.mxu1 %v2131_v3  ;;  %266 = vmatpush.msra.mxu2 %v2253_v58  ;;  %v338_v3 = vand.u32 4294901760, %v337_v38  ;;  %v377_v34 = vsub.f32 %v232_v30, %v279_v32 }
  0x19   :  { %395 = vmatpush.msrb.mxu0 %v2169_v18  ;;  %172 = vmatmul.f32.vlgmr.msrb.gmra.mxu1 %v79_v31  ;;  %v366_v31 = vand.u32 4294901760, %v2337_v46  ;;  %v356_v56 = vand.u32 4294901760, %v355_v23  ;;  %v373_v0 = vsub.f32 %v2347_v49, %v372_v52 }
  0x1a   :  { %327 = vmatpush.msra.mxu3 %v326_v35  ;;  %222 = vmatpush.msra.mxu1 %v2133_v4  ;;  %v361_v4 = vsub.f32 %v2322_v40, %v360_v48  ;;  %v378_v25 = vand.u32 4294901760, %v377_v34  ;;  %v383_v35 = vsub.f32 %v231_v16, %v281_v17 }
  0x1b   :  { %268 = vmatpush.msra.mxu2 %v2255_v59  ;;  %398 = vmatpush.msrb.mxu0 %v2172_v19 }
  0x1c   :  { %333 = vmatpush.msra.mxu3 %v332_v43  ;;  %224 = vmatpush.msra.mxu1 %v2135_v5  ;;  %v367_v5 = vsub.f32 %v2337_v46, %v366_v31  ;;  %v362_v57 = vand.u32 4294901760, %v361_v4  ;;  %v379_v38 = vsub.f32 %v377_v34, %v378_v25  ;;  %v384_v43 = vand.u32 4294901760, %v383_v35  ;;  %v600_v4 = vld [vmem:[%s3517_s5 + $0x38] sm:$0xff] }
  0x1d   :  { %270 = vmatpush.msra.mxu2 %v2266_v63  ;;  %401 = vmatpush.msrb.mxu0 %v2189_v28  ;;  %v606_v28 = vld [vmem:[%s3517_s5 + $0x68] sm:$0xff] }
  0x1e   :  { %339 = vmatpush.msra.mxu3 %v338_v3  ;;  %448 = vmatpush.msrb.mxu1 %v2146_v10  ;;  %v368_v7 = vand.u32 4294901760, %v367_v5  ;;  %v380_v44 = vand.u32 4294901760, %v379_v38  ;;  %v385_v3 = vsub.f32 %v383_v35, %v384_v43 }
  0x1f   :  { %202 = vmatmul.f32.vlgmr.msra.gmra.mxu0 %v2160_v15  ;;  %272 = vmatpush.msra.mxu2 %v2277_v6 }
  0x20   :  { %345 = vmatpush.msra.mxu3 %v344_v50  ;;  %450 = vmatpush.msrb.mxu1 %v2148_v11  ;;  %v386_v47 = vand.u32 4294901760, %v385_v3  ;;  %v596_v3 = vld [vmem:[%s3517_s5 + $0x18] sm:$0xff] }
  0x21   :  { %274 = vmatpush.msra.mxu2 %v2290_v22  ;;  %226 = vmatmul.f32.vlgmr.msra.gmra.mxu1 %v2160_v15  ;;  %v374_v15 = vand.u32 4294901760, %v373_v0 }
  0x22   :  { %351 = vmatpush.msra.mxu3 %v350_v51  ;;  %404 = vmatpush.msrb.mxu0 %v2192_v29 }
  0x23   :  { %452 = vmatpush.msrb.mxu1 %v2174_v20  ;;  %276 = vmatpush.msra.mxu2 %v2326_v41 }
  0x24   :  { %357 = vmatpush.msra.mxu3 %v356_v56  ;;  %407 = vmatpush.msrb.mxu0 %v2258_v60 }
  0x25   :  { %454 = vmatpush.msrb.mxu1 %v2176_v21  ;;  %278 = vmatpush.msra.mxu2 %v2328_v42 }
  0x26   :  { %363 = vmatpush.msra.mxu3 %v362_v57  ;;  %410 = vmatpush.msrb.mxu0 %v2261_v61 }
  0x27   :  { %456 = vmatpush.msrb.mxu1 %v2243_v53  ;;  %280 = vmatpush.msra.mxu2 %v279_v32 }
  0x28   :  { %369 = vmatpush.msra.mxu3 %v368_v7  ;;  %413 = vmatpush.msrb.mxu0 %v2264_v62  ;;  %v598_v7 = vld [vmem:[%s3517_s5 + $0x28] sm:$0xff] }
  0x29   :  { %458 = vmatpush.msrb.mxu1 %v2245_v54  ;;  %282 = vmatpush.msra.mxu2 %v281_v17 }
  0x2a   :  { %375 = vmatpush.msra.mxu3 %v374_v15  ;;  %416 = vmatpush.msrb.mxu0 %v2272_v1  ;;  %v601_v1 = vld [vmem:[%s3517_s5 + $0x40] sm:$0xff] }
  0x2b   :  { %460 = vmatpush.msrb.mxu1 %v2247_v55  ;;  %489 = vmatpush.msrb.mxu2 %v294_v26  ;;  %v608_v26 = vld [vmem:[%s3517_s5 + $0x78] sm:$0xff] }
  0x2c   :  { %419 = vmatpush.msrb.mxu0 %v2275_v2  ;;  %381 = vmatpush.msra.mxu3 %v380_v44  ;;  %v2562_v44 = vand.u32 4294901760, %v598_v7 }
  0x2d   :  { %462 = vmatpush.msrb.mxu1 %v2253_v58  ;;  %493 = vmatpush.msrb.mxu2 %v300_v27  ;;  %v607_v27 = vld [vmem:[%s3517_s5 + $0x70] sm:$0xff] }
  0x2e   :  { %422 = vmatpush.msrb.mxu0 %v2288_v14  ;;  %387 = vmatpush.msra.mxu3 %v386_v47 }
  0x2f   :  { %464 = vmatpush.msrb.mxu1 %v2255_v59  ;;  %497 = vmatpush.msrb.mxu2 %v306_v36  ;;  %v2460_v36 = vand.u32 4294901760, %v608_v26 }
  0x30   :  { %425 = vmatpush.msrb.mxu0 %v2307_v33  ;;  %556 = vmatpush.msrb.mxu3 %v2146_v10 }
  0x31   :  { %466 = vmatpush.msrb.mxu1 %v2266_v63  ;;  %501 = vmatpush.msrb.mxu2 %v312_v37  ;;  %v2462_v37 = vand.u32 4294901760, %v607_v27  ;;  %v2488_v2 = vsub.f32 %v608_v26, %v2460_v36 }
  0x32   :  { %428 = vmatpush.msrb.mxu0 %v2322_v40  ;;  %558 = vmatpush.msrb.mxu3 %v2148_v11  ;;  %v2046_v11 = vld [vmem:[%s3516_s2] ss:$0 sm:$0xff] }
  0x33   :  { %468 = vmatpush.msrb.mxu1 %v2277_v6  ;;  %505 = vmatpush.msrb.mxu2 %v318_v8 }
  0x34   :  { %431 = vmatpush.msrb.mxu0 %v2337_v46  ;;  %560 = vmatpush.msrb.mxu3 %v2174_v20 }
  0x35   :  { %470 = vmatpush.msrb.mxu1 %v2290_v22  ;;  %509 = vmatpush.msrb.mxu2 %v324_v9 }
  0x36   :  { %434 = vmatpush.msrb.mxu0 %v2347_v49  ;;  %562 = vmatpush.msrb.mxu3 %v2176_v21 }
  0x37   :  { %472 = vmatpush.msrb.mxu1 %v2326_v41  ;;  %513 = vmatpush.msrb.mxu2 %v330_v12 }
  0x38   :  { %437 = vmatpush.msrb.mxu0 %v377_v34  ;;  %564 = vmatpush.msrb.mxu3 %v2243_v53  ;;  %v2464_v53 = vand.u32 4294901760, %v606_v28 }
  0x39   :  { %474 = vmatpush.msrb.mxu1 %v2328_v42  ;;  %517 = vmatpush.msrb.mxu2 %v336_v13 }
  0x3a   :  { %440 = vmatpush.msrb.mxu0 %v383_v35  ;;  %566 = vmatpush.msrb.mxu3 %v2245_v54  ;;  %v605_v54 = vld [vmem:[%s3517_s5 + $0x60] sm:$0xff]  ;;  %v2494_v8 = vsub.f32 %v606_v28, %v2464_v53  ;;  %v2584_v28 = vand.u32 4294901760, %v596_v3 }
  0x3b   :  { %476 = vmatpush.msrb.mxu1 %v279_v32  ;;  %521 = vmatpush.msrb.mxu2 %v342_v24  ;;  %v2475_v60 = vand.u32 4294901760, %v605_v54  ;;  %v656_v24 = vand.u32 4294901760, %v2488_v2 }
  0x3c   :  { %568 = vmatpush.msrb.mxu3 %v2247_v55  ;;  %v604_v55 = vld [vmem:[%s3517_s5 + $0x58] sm:$0xff]  ;;  %614 = vmatpush.msra.mxu0 %v2460_v36 }
  0x3d   :  { %478 = vmatpush.msrb.mxu1 %v281_v17  ;;  %525 = vmatpush.msrb.mxu2 %v348_v39  ;;  %v2477_v61 = vand.u32 4294901760, %v604_v55  ;;  %v2500_v12 = vsub.f32 %v605_v54, %v2475_v60  ;;  %v668_v39 = vand.u32 4294901760, %v2494_v8  ;;  %v657_v46 = vsub.f32 %v2488_v2, %v656_v24 }
  0x3e   :  { %570 = vmatpush.msrb.mxu3 %v2253_v58  ;;  %v603_v58 = vld [vmem:[%s3517_s5 + $0x50] sm:$0xff]  ;;  %616 = vmatpush.msra.mxu0 %v2462_v37 }
  0x3f   :  { %529 = vmatpush.msrb.mxu2 %v354_v45  ;;  %v2479_v62 = vand.u32 4294901760, %v603_v58  ;;  %v2503_v13 = vsub.f32 %v604_v55, %v2477_v61  ;;  %v669_v49 = vsub.f32 %v2494_v8, %v668_v39  ;;  %v658_v5 = vand.u32 4294901760, %v657_v46 }
  0x40   :  { %572 = vmatpush.msrb.mxu3 %v2255_v59  ;;  %618 = vmatpush.msra.mxu0 %v2464_v53  ;;  %v2601_v46 = vsub.f32 %v596_v3, %v2584_v28  ;;  %v594_v3 = vld [vmem:[%s3517_s5 + $0x8] sm:$0xff] }
  0x41   :  { %533 = vmatpush.msrb.mxu2 %v360_v48  ;;  %v2506_v14 = vsub.f32 %v603_v58, %v2479_v62  ;;  %v680_v45 = vand.u32 4294901760, %v2503_v13  ;;  %659 = vmatpush.msra.mxu1 %v658_v5  ;;  %v670_v16 = vand.u32 4294901760, %v669_v49 }
  0x42   :  { %574 = vmatpush.msrb.mxu3 %v2266_v63  ;;  %v602_v63 = vld [vmem:[%s3517_s5 + $0x48] sm:$0xff]  ;;  %620 = vmatpush.msra.mxu0 %v2475_v60 }
  0x43   :  { %537 = vmatpush.msrb.mxu2 %v366_v31  ;;  %v2497_v9 = vand.u32 4294901760, %v602_v63  ;;  %v686_v31 = vand.u32 4294901760, %v2506_v14  ;;  %v681_v30 = vsub.f32 %v2503_v13, %v680_v45 }
  0x44   :  { %576 = vmatpush.msrb.mxu3 %v2277_v6  ;;  %v2491_v6 = vsub.f32 %v607_v27, %v2462_v37  ;;  %622 = vmatpush.msra.mxu0 %v2477_v61  ;;  %v2582_v27 = vsub.f32 %v598_v7, %v2562_v44 }
  0x45   :  { %541 = vmatpush.msrb.mxu2 %v372_v52  ;;  %v2527_v50 = vsub.f32 %v602_v63, %v2497_v9  ;;  %v599_v52 = vld [vmem:[%s3517_s5 + $0x30] sm:$0xff]  ;;  %v687_v38 = vsub.f32 %v2506_v14, %v686_v31 }
  0x46   :  { %578 = vmatpush.msrb.mxu3 %v2290_v22  ;;  %v2508_v22 = vand.u32 4294901760, %v601_v1  ;;  %v662_v33 = vand.u32 4294901760, %v2491_v6  ;;  %624 = vmatpush.msra.mxu0 %v2479_v62 }
  0x47   :  { %545 = vmatpush.msrb.mxu2 %v378_v25  ;;  %v692_v34 = vand.u32 4294901760, %v2527_v50  ;;  %v2556_v25 = vand.u32 4294901760, %v599_v52  ;;  %v688_v54 = vand.u32 4294901760, %v687_v38 }
  0x48   :  { %580 = vmatpush.msrb.mxu3 %v2326_v41  ;;  %v663_v48 = vsub.f32 %v2491_v6, %v662_v33  ;;  %v2531_v51 = vsub.f32 %v601_v1, %v2508_v22  ;;  %626 = vmatpush.msra.mxu0 %v2497_v9 }
  0x49   :  { %549 = vmatpush.msrb.mxu2 %v384_v43 }
  0x4a   :  { %582 = vmatpush.msrb.mxu3 %v2328_v42  ;;  %v674_v42 = vand.u32 4294901760, %v2500_v12  ;;  %v664_v57 = vand.u32 4294901760, %v663_v48  ;;  %v698_v43 = vand.u32 4294901760, %v2531_v51  ;;  %628 = vmatpush.msra.mxu0 %v2508_v22 }
  0x4c   :  { %584 = vmatpush.msrb.mxu3 %v279_v32  ;;  %v675_v0 = vsub.f32 %v2500_v12, %v674_v42  ;;  %v597_v32 = vld [vmem:[%s3517_s5 + $0x20] sm:$0xff]  ;;  %665 = vmatpush.msra.mxu1 %v664_v57  ;;  %v699_v55 = vsub.f32 %v2531_v51, %v698_v43  ;;  %v728_v57 = vand.u32 4294901760, %v2601_v46 }
  0x4e   :  { %586 = vmatpush.msrb.mxu3 %v281_v17  ;;  %v2554_v17 = vand.u32 4294901760, %v600_v4  ;;  %v676_v47 = vand.u32 4294901760, %v675_v0  ;;  %671 = vmatpush.msra.mxu1 %v670_v16  ;;  %v700_v49 = vand.u32 4294901760, %v699_v55 }
  0x50   :  { %677 = vmatpush.msra.mxu1 %v676_v47  ;;  %630 = vmatpush.msra.mxu0 %v2554_v17 }
  0x52   :  { %632 = vmatpush.msra.mxu0 %v2556_v25 }
  0x54   :  { %634 = vmatpush.msra.mxu0 %v2562_v44 }
  0x8c   :  { %v83_v10 = vpop.f32.mrf.mxu0 }
  0x8d   :  { %v84_v19 = vadd.f32 %v2046_v11, %v83_v10  ;;  %v2568_v10 = vsub.f32 %v600_v4, %v2554_v17  ;;  %v2572_v11 = vsub.f32 %v599_v52, %v2556_v25 }
  0x8e   :  { %v119_v18 = vpop.f32.mrf.mxu1 }
  0x8f   :  { %v120_v21 = vadd.f32 %v119_v18, %v84_v19  ;;  %v2574_v18 = vand.u32 4294901760, %v597_v32  ;;  %v704_v26 = vand.u32 4294901760, %v2568_v10  ;;  %v710_v58 = vand.u32 4294901760, %v2572_v11 }
  0x91   :  { %636 = vmatpush.msra.mxu0 %v2574_v18 }
  0x93   :  { %638 = vmatpush.msra.mxu0 %v2584_v28 }
  0x94   :  { %v147_v20 = vpop.f32.mrf.mxu0 }
  0x95   :  { %v148_v59 = vadd.f32 %v147_v20, %v120_v21  ;;  %v682_v20 = vand.u32 4294901760, %v681_v30  ;;  %v693_v21 = vsub.f32 %v2527_v50, %v692_v34  ;;  %v729_v30 = vsub.f32 %v2601_v46, %v728_v57 }
  0x96   :  { %v173_v29 = vpop.f32.mrf.mxu1 }
  0x97   :  { %v174_v40 = vadd.f32 %v173_v29, %v148_v59  ;;  %v2592_v59 = vsub.f32 %v597_v32, %v2574_v18  ;;  %683 = vmatpush.msra.mxu1 %v682_v20  ;;  %v694_v1 = vand.u32 4294901760, %v693_v21  ;;  %v730_v16 = vand.u32 4294901760, %v729_v30  ;;  %v593_v20 = vld [vmem:[%s3517_s5] sm:$0xff]  ;;  %v962_v30 = vld [vmem:[%s3519_s7 + $0x38] sm:$0xff] }
  0x99   :  { %689 = vmatpush.msra.mxu1 %v688_v54  ;;  %v722_v4 = vand.u32 4294901760, %v2592_v59  ;;  %v643_v54 = vand.u32 4294901760, %v593_v20 }
  0x9b   :  { %695 = vmatpush.msra.mxu1 %v694_v1  ;;  %v723_v7 = vsub.f32 %v2592_v59, %v722_v4  ;;  %v745_v1 = vsub.f32 %v593_v20, %v643_v54 }
  0x9c   :  { %v203_v41 = vpop.f32.mrf.mxu0 }
  0x9d   :  { %v204_v23 = vadd.f32 %v203_v41, %v174_v40  ;;  %v705_v40 = vsub.f32 %v2568_v10, %v704_v26  ;;  %v716_v41 = vand.u32 4294901760, %v2582_v27  ;;  %701 = vmatpush.msra.mxu1 %v700_v49  ;;  %v724_v32 = vand.u32 4294901760, %v723_v7 }
  0x9e   :  { %v227_v56 = vpop.f32.mrf.mxu1  ;;  %v746_v49 = vand.u32 4294901760, %v745_v1 }
  0x9f   :  { %v228_v15 = vadd.f32 %v227_v56, %v204_v23  ;;  %v711_v23 = vsub.f32 %v2572_v11, %v710_v58  ;;  %v706_v56 = vand.u32 4294901760, %v705_v40  ;;  %v717_v5 = vsub.f32 %v2582_v27, %v716_v41 }
  0xa1   :  { %v230_v35 = vmax.f32 %v228_v15, 0.0  ;;  %v712_v0 = vand.u32 4294901760, %v711_v23  ;;  %707 = vmatpush.msra.mxu1 %v706_v56  ;;  %v718_v15 = vand.u32 4294901760, %v717_v5 }
  0xa3   :  { %v283_v19 = vand.u32 4294901760, %v230_v35  ;;  %713 = vmatpush.msra.mxu1 %v712_v0 }
  0xa5   :  { %v284_v29 = vsub.f32 %v230_v35, %v283_v19  ;;  %389 = vmatmul.f32.vlgmr.msra.gmra.mxu3 %v283_v19  ;;  %719 = vmatpush.msra.mxu1 %v718_v15  ;;  %v595_v35 = vld [vmem:[%s3517_s5 + $0x10] sm:$0xff]  ;;  %v963_v15 = vld [vmem:[%s3519_s7 + $0x40] sm:$0xff] }
  0xa6   :  { %810 = vmatpush.msra.mxu3 %v2460_v36  ;;  %v639_v38 = vand.u32 4294901760, %v595_v35 }
  0xa7   :  { %443 = vmatmul.f32.vlgmr.msrb.gmra.mxu0 %v284_v29  ;;  %v285_v63 = vand.u32 4294901760, %v284_v29  ;;  %725 = vmatpush.msra.mxu1 %v724_v32  ;;  %v961_v32 = vld [vmem:[%s3519_s7 + $0x30] sm:$0xff] }
  0xa8   :  { %812 = vmatpush.msra.mxu3 %v2462_v37  ;;  %v733_v47 = vsub.f32 %v595_v35, %v639_v38  ;;  %640 = vmatpush.msra.mxu0 %v639_v38 }
  0xa9   :  { %482 = vmatmul.f32.vlgmr.msrb.gmra.mxu1 %v285_v63  ;;  %v286_v48 = vsub.f32 %v284_v29, %v285_v63 }
  0xaa   :  { %814 = vmatpush.msra.mxu3 %v2464_v53  ;;  %731 = vmatpush.msra.mxu1 %v730_v16  ;;  %v734_v21 = vand.u32 4294901760, %v733_v47 }
  0xab   :  { %v287_v52 = vand.u32 4294901760, %v286_v48 }
  0xac   :  { %816 = vmatpush.msra.mxu3 %v2475_v60  ;;  %v735_v55 = vsub.f32 %v733_v47, %v734_v21 }
  0xad   :  { %288 = vmatmul.f32.vlgmr.msra.gmra.mxu2 %v287_v52  ;;  %588 = vmatmul.f32.vlgmr.msrb.gmra.mxu3 %v283_v19  ;;  %v747_v52 = vsub.f32 %v745_v1, %v746_v49 }
  0xae   :  { %757 = vmatpush.msra.mxu2 %v2488_v2  ;;  %818 = vmatpush.msra.mxu3 %v2477_v61  ;;  %v736_v40 = vand.u32 4294901760, %v735_v55  ;;  %v968_v2 = vld [vmem:[%s3519_s7 + $0x68] sm:$0xff]  ;;  %v2797_v55 = vand.u32 4294901760, %v962_v30 }
  0xaf   :  { %v748_v56 = vand.u32 4294901760, %v747_v52 }
  0xb0   :  { %760 = vmatpush.msra.mxu2 %v2491_v6  ;;  %820 = vmatpush.msra.mxu3 %v2479_v62 }
  0xb1   :  { %737 = vmatpush.msra.mxu1 %v736_v40 }
  0xb2   :  { %763 = vmatpush.msra.mxu2 %v2494_v8  ;;  %822 = vmatpush.msra.mxu3 %v2497_v9 }
  0xb4   :  { %766 = vmatpush.msra.mxu2 %v2500_v12  ;;  %824 = vmatpush.msra.mxu3 %v2508_v22  ;;  %v967_v12 = vld [vmem:[%s3519_s7 + $0x60] sm:$0xff] }
  0xb5   :  { %551 = vmatmul.f32.vlgmr.msrb.gmra.mxu2 %v283_v19  ;;  %v641_v19 = vand.u32 4294901760, %v594_v3 }
  0xb6   :  { %769 = vmatpush.msra.mxu2 %v2503_v13  ;;  %826 = vmatpush.msra.mxu3 %v2554_v17  ;;  %v966_v13 = vld [vmem:[%s3519_s7 + $0x58] sm:$0xff] }
  0xb7   :  { %v739_v29 = vsub.f32 %v594_v3, %v641_v19  ;;  %642 = vmatpush.msra.mxu0 %v641_v19  ;;  %v960_v3 = vld [vmem:[%s3519_s7 + $0x28] sm:$0xff] }
  0xb8   :  { %772 = vmatpush.msra.mxu2 %v2506_v14  ;;  %828 = vmatpush.msra.mxu3 %v2556_v25  ;;  %v965_v14 = vld [vmem:[%s3519_s7 + $0x50] sm:$0xff] }
  0xb9   :  { %v740_v63 = vand.u32 4294901760, %v739_v29  ;;  %644 = vmatpush.msra.mxu0 %v643_v54 }
  0xba   :  { %775 = vmatpush.msra.mxu2 %v2527_v50  ;;  %830 = vmatpush.msra.mxu3 %v2562_v44 }
  0xbb   :  { %851 = vmatpush.msrb.mxu0 %v656_v24  ;;  %v741_v48 = vsub.f32 %v739_v29, %v740_v63  ;;  %v2721_v24 = vand.u32 4294901760, %v967_v12 }
  0xbc   :  { %778 = vmatpush.msra.mxu2 %v2531_v51  ;;  %832 = vmatpush.msra.mxu3 %v2574_v18 }
  0xbd   :  { %855 = vmatpush.msrb.mxu0 %v662_v33  ;;  %v742_v23 = vand.u32 4294901760, %v741_v48  ;;  %v2723_v33 = vand.u32 4294901760, %v966_v13 }
  0xbe   :  { %781 = vmatpush.msra.mxu2 %v2568_v10  ;;  %834 = vmatpush.msra.mxu3 %v2584_v28 }
  0xbf   :  { %859 = vmatpush.msrb.mxu0 %v668_v39  ;;  %743 = vmatpush.msra.mxu1 %v742_v23  ;;  %v2725_v39 = vand.u32 4294901760, %v965_v14  ;;  %v958_v23 = vld [vmem:[%s3519_s7 + $0x18] sm:$0xff] }
  0xc0   :  { %784 = vmatpush.msra.mxu2 %v2572_v11  ;;  %836 = vmatpush.msra.mxu3 %v639_v38 }
  0xc1   :  { %863 = vmatpush.msrb.mxu0 %v674_v42  ;;  %749 = vmatpush.msra.mxu1 %v748_v56  ;;  %v964_v42 = vld [vmem:[%s3519_s7 + $0x48] sm:$0xff]  ;;  %v2813_v56 = vsub.f32 %v962_v30, %v2797_v55 }
  0xc2   :  { %787 = vmatpush.msra.mxu2 %v2582_v27  ;;  %838 = vmatpush.msra.mxu3 %v641_v19 }
  0xc3   :  { %918 = vmatpush.msrb.mxu1 %v2460_v36  ;;  %867 = vmatpush.msrb.mxu0 %v680_v45  ;;  %v2047_v36 = vld [vmem:[%s3518_s4] ss:$0 sm:$0xff] }
  0xc4   :  { %790 = vmatpush.msra.mxu2 %v2592_v59  ;;  %840 = vmatpush.msra.mxu3 %v643_v54 }
  0xc5   :  { %920 = vmatpush.msrb.mxu1 %v2462_v37  ;;  %871 = vmatpush.msrb.mxu0 %v686_v31 }
  0xc6   :  { %793 = vmatpush.msra.mxu2 %v2601_v46 }
  0xc7   :  { %922 = vmatpush.msrb.mxu1 %v2464_v53  ;;  %875 = vmatpush.msrb.mxu0 %v692_v34  ;;  %v2740_v34 = vand.u32 4294901760, %v964_v42 }
  0xc8   :  { %796 = vmatpush.msra.mxu2 %v733_v47 }
  0xc9   :  { %924 = vmatpush.msrb.mxu1 %v2475_v60  ;;  %879 = vmatpush.msrb.mxu0 %v698_v43  ;;  %v2746_v43 = vsub.f32 %v966_v13, %v2723_v33  ;;  %v2758_v59 = vsub.f32 %v964_v42, %v2740_v34 }
  0xca   :  { %799 = vmatpush.msra.mxu2 %v739_v29 }
  0xcb   :  { %926 = vmatpush.msrb.mxu1 %v2477_v61  ;;  %883 = vmatpush.msrb.mxu0 %v704_v26  ;;  %v970_v61 = vld [vmem:[%s3519_s7 + $0x78] sm:$0xff]  ;;  %v1054_v20 = vand.u32 4294901760, %v2758_v59 }
  0xcc   :  { %802 = vmatpush.msra.mxu2 %v745_v1  ;;  %v2706_v6 = vand.u32 4294901760, %v970_v61 }
  0xcd   :  { %928 = vmatpush.msrb.mxu1 %v2479_v62  ;;  %887 = vmatpush.msrb.mxu0 %v710_v58  ;;  %v969_v62 = vld [vmem:[%s3519_s7 + $0x70] sm:$0xff]  ;;  %v1042_v58 = vand.u32 4294901760, %v2746_v43 }
  0xce   :  { %v2708_v8 = vand.u32 4294901760, %v969_v62  ;;  %v2731_v50 = vsub.f32 %v970_v61, %v2706_v6  ;;  %976 = vmatpush.msrb.mxu2 %v2706_v6 }
  0xcf   :  { %930 = vmatpush.msrb.mxu1 %v2497_v9  ;;  %891 = vmatpush.msrb.mxu0 %v716_v41  ;;  %v2710_v9 = vand.u32 4294901760, %v968_v2 }
  0xd0   :  { %v2734_v31 = vsub.f32 %v969_v62, %v2708_v8  ;;  %v1018_v11 = vand.u32 4294901760, %v2731_v50  ;;  %978 = vmatpush.msrb.mxu2 %v2708_v8  ;;  %v1055_v62 = vsub.f32 %v2758_v59, %v1054_v20 }
  0xd1   :  { %932 = vmatpush.msrb.mxu1 %v2508_v22  ;;  %895 = vmatpush.msrb.mxu0 %v722_v4  ;;  %v2737_v51 = vsub.f32 %v968_v2, %v2710_v9 }
  0xd2   :  { %v1019_v46 = vsub.f32 %v2731_v50, %v1018_v11  ;;  %980 = vmatpush.msrb.mxu2 %v2710_v9 }
  0xd3   :  { %934 = vmatpush.msrb.mxu1 %v2554_v17  ;;  %899 = vmatpush.msrb.mxu0 %v728_v57  ;;  %v1030_v26 = vand.u32 4294901760, %v2737_v51 }
  0xd4   :  { %v1020_v35 = vand.u32 4294901760, %v1019_v46  ;;  %982 = vmatpush.msrb.mxu2 %v2721_v24  ;;  %v956_v46 = vld [vmem:[%s3519_s7 + $0x8] sm:$0xff] }
  0xd5   :  { %936 = vmatpush.msrb.mxu1 %v2556_v25  ;;  %903 = vmatpush.msrb.mxu0 %v734_v21  ;;  %v2743_v25 = vsub.f32 %v967_v12, %v2721_v24  ;;  %v1031_v5 = vsub.f32 %v2737_v51, %v1030_v26  ;;  %v959_v21 = vld [vmem:[%s3519_s7 + $0x20] sm:$0xff]  ;;  %v1066_v12 = vand.u32 4294901760, %v2813_v56 }
  0xd6   :  { %1021 = vmatpush.msrb.mxu3 %v1020_v35  ;;  %984 = vmatpush.msrb.mxu2 %v2723_v33 }
  0xd7   :  { %938 = vmatpush.msrb.mxu1 %v2562_v44  ;;  %907 = vmatpush.msrb.mxu0 %v740_v63  ;;  %v2749_v44 = vsub.f32 %v965_v14, %v2725_v39  ;;  %v1032_v29 = vand.u32 4294901760, %v1031_v5  ;;  %v2799_v63 = vand.u32 4294901760, %v961_v32  ;;  %v2835_v14 = vand.u32 4294901760, %v958_v23 }
  0xd8   :  { %986 = vmatpush.msrb.mxu2 %v2725_v39  ;;  %v1067_v5 = vsub.f32 %v2813_v56, %v1066_v12 }
  0xd9   :  { %940 = vmatpush.msrb.mxu1 %v2574_v18  ;;  %911 = vmatpush.msrb.mxu0 %v746_v49  ;;  %v1024_v18 = vand.u32 4294901760, %v2734_v31  ;;  %v1048_v7 = vand.u32 4294901760, %v2749_v44  ;;  %v2804_v49 = vand.u32 4294901760, %v960_v3 }
  0xda   :  { %988 = vmatpush.msrb.mxu2 %v2740_v34 }
  0xdb   :  { %942 = vmatpush.msrb.mxu1 %v2584_v28  ;;  %v1036_v28 = vand.u32 4294901760, %v2743_v25  ;;  %v1025_v4 = vsub.f32 %v2734_v31, %v1024_v18  ;;  %v1049_v48 = vsub.f32 %v2749_v44, %v1048_v7  ;;  %v2833_v13 = vsub.f32 %v960_v3, %v2804_v49 }
  0xdd   :  { %944 = vmatpush.msrb.mxu1 %v639_v38  ;;  %v1037_v0 = vsub.f32 %v2743_v25, %v1036_v28  ;;  %v1026_v38 = vand.u32 4294901760, %v1025_v4  ;;  %v1056_v4 = vand.u32 4294901760, %v1055_v62 }
  0xdf   :  { %946 = vmatpush.msrb.mxu1 %v641_v19  ;;  %v1043_v19 = vsub.f32 %v2746_v43, %v1042_v58  ;;  %v1038_v40 = vand.u32 4294901760, %v1037_v0  ;;  %1027 = vmatpush.msrb.mxu3 %v1026_v38  ;;  %v2859_v0 = vsub.f32 %v958_v23, %v2835_v14  ;;  %v2870_v38 = vand.u32 4294901760, %v956_v46 }
  0xe1   :  { %948 = vmatpush.msrb.mxu1 %v643_v54  ;;  %v2794_v54 = vand.u32 4294901760, %v963_v15  ;;  %v1044_v61 = vand.u32 4294901760, %v1043_v19  ;;  %1033 = vmatpush.msrb.mxu3 %v1032_v29  ;;  %v2879_v29 = vsub.f32 %v956_v46, %v2870_v38 }
  0xe3   :  { %v2810_v52 = vsub.f32 %v963_v15, %v2794_v54  ;;  %1039 = vmatpush.msrb.mxu3 %v1038_v40  ;;  %990 = vmatpush.msrb.mxu2 %v2794_v54 }
  0xe5   :  { %v1060_v2 = vand.u32 4294901760, %v2810_v52  ;;  %1045 = vmatpush.msrb.mxu3 %v1044_v61  ;;  %992 = vmatpush.msrb.mxu2 %v2797_v55  ;;  %v1102_v61 = vand.u32 4294901760, %v2879_v29 }
  0xe7   :  { %994 = vmatpush.msrb.mxu2 %v2799_v63 }
  0xe9   :  { %996 = vmatpush.msrb.mxu2 %v2804_v49 }
 0x124   :  { %v444_v45 = vpop.f32.mrf.mxu0 }
 0x126   :  { %v483_v10 = vpop.f32.mrf.mxu1 }
 0x128   :  { %v390_v37 = vpop.f32.mrf.mxu3 }
 0x130   :  { %v289_v53 = vpop.f32.mrf.mxu2  ;;  %v589_v16 = vpop.f32.mrf.mxu3 }
 0x131   :  { %v290_v60 = vadd.f32 %v2047_v36, %v289_v53  ;;  %v2817_v36 = vsub.f32 %v961_v32, %v2799_v63  ;;  %v957_v53 = vld [vmem:[%s3519_s7 + $0x10] sm:$0xff] }
 0x132   :  { %v2839_v42 = vand.u32 4294901760, %v957_v53 }
 0x133   :  { %v391_v22 = vadd.f32 %v390_v37, %v290_v60  ;;  %v2819_v37 = vand.u32 4294901760, %v959_v21 }
 0x134   :  { %v2862_v30 = vsub.f32 %v957_v53, %v2839_v42 }
 0x135   :  { %v445_v17 = vadd.f32 %v444_v45, %v391_v22  ;;  %v1050_v45 = vand.u32 4294901760, %v1049_v48  ;;  %998 = vmatpush.msrb.mxu2 %v2819_v37 }
 0x136   :  { %v1096_v48 = vand.u32 4294901760, %v2862_v30 }
 0x137   :  { %v484_v27 = vadd.f32 %v483_v10, %v445_v17  ;;  %v1061_v17 = vsub.f32 %v2810_v52, %v1060_v2  ;;  %v1072_v10 = vand.u32 4294901760, %v2817_v36  ;;  %1051 = vmatpush.msrb.mxu3 %v1050_v45  ;;  %1000 = vmatpush.msrb.mxu2 %v2835_v14 }
 0x138   :  { %v552_v41 = vpop.f32.mrf.mxu2 }
 0x139   :  { %v553_v57 = vadd.f32 %v552_v41, %v484_v27  ;;  %v2847_v27 = vsub.f32 %v959_v21, %v2819_v37  ;;  %v1062_v32 = vand.u32 4294901760, %v1061_v17  ;;  %1057 = vmatpush.msrb.mxu3 %v1056_v4  ;;  %v1090_v21 = vand.u32 4294901760, %v2859_v0  ;;  %1002 = vmatpush.msrb.mxu2 %v2839_v42 }
 0x13a   :  { %v1103_v17 = vsub.f32 %v2879_v29, %v1102_v61 }
 0x13b   :  { %v590_v47 = vadd.f32 %v589_v16, %v553_v57  ;;  %v1078_v57 = vand.u32 4294901760, %v2833_v13  ;;  %v1073_v16 = vsub.f32 %v2817_v36, %v1072_v10  ;;  %v1084_v35 = vand.u32 4294901760, %v2847_v27  ;;  %1063 = vmatpush.msrb.mxu3 %v1062_v32  ;;  %1004 = vmatpush.msrb.mxu2 %v2870_v38 }
 0x13c   :  { %v1091_v53 = vsub.f32 %v2859_v0, %v1090_v21  ;;  %v1104_v46 = vand.u32 4294901760, %v1103_v17 }
 0x13d   :  { %v592_v1 = vmax.f32 %v590_v47, 0.0  ;;  %v1068_v47 = vand.u32 4294901760, %v1067_v5  ;;  %v1079_v19 = vsub.f32 %v2833_v13, %v1078_v57  ;;  %v1085_v40 = vsub.f32 %v2847_v27, %v1084_v35 }
 0x13e   :  { %v1092_v45 = vand.u32 4294901760, %v1091_v53 }
 0x13f   :  { %v2824_v60 = vand.u32 4294901760, %v592_v1  ;;  %1069 = vmatpush.msrb.mxu3 %v1068_v47  ;;  %v1080_v23 = vand.u32 4294901760, %v1079_v19  ;;  %v1086_v62 = vand.u32 4294901760, %v1085_v40  ;;  %v1325_v47 = vld [vmem:[%s3521_s9 + $0x40] sm:$0xff]  ;;  %v1324_v19 = vld [vmem:[%s3521_s9 + $0x38] sm:$0xff] }
 0x140   :  { %v3079_v17 = vand.u32 4294901760, %v1324_v19 }
 0x141   :  { %v646_v22 = vsub.f32 %v592_v1, %v2824_v60  ;;  %751 = vmatmul.f32.vlgmr.msra.gmra.mxu1 %v2824_v60  ;;  %v1074_v1 = vand.u32 4294901760, %v1073_v16 }
 0x142   :  { %1172 = vmatpush.msra.mxu1 %v2706_v6 }
 0x143   :  { %805 = vmatmul.f32.vlgmr.msra.gmra.mxu2 %v646_v22  ;;  %v647_v41 = vand.u32 4294901760, %v646_v22  ;;  %1075 = vmatpush.msrb.mxu3 %v1074_v1 }
 0x144   :  { %1174 = vmatpush.msra.mxu1 %v2708_v8 }
 0x145   :  { %844 = vmatmul.f32.vlgmr.msra.gmra.mxu3 %v647_v41  ;;  %v648_v15 = vsub.f32 %v646_v22, %v647_v41  ;;  %v1097_v22 = vsub.f32 %v2862_v30, %v1096_v48 }
 0x146   :  { %1176 = vmatpush.msra.mxu1 %v2710_v9  ;;  %1081 = vmatpush.msrb.mxu3 %v1080_v23 }
 0x147   :  { %v649_v3 = vand.u32 4294901760, %v648_v15  ;;  %v1098_v41 = vand.u32 4294901760, %v1097_v22 }
 0x148   :  { %1178 = vmatpush.msra.mxu1 %v2721_v24  ;;  %1087 = vmatpush.msrb.mxu3 %v1086_v62  ;;  %v1321_v62 = vld [vmem:[%s3521_s9 + $0x20] sm:$0xff] }
 0x149   :  { %650 = vmatmul.f32.vlgmr.msra.gmra.mxu0 %v649_v3  ;;  %950 = vmatmul.f32.vlgmr.msrb.gmra.mxu1 %v2824_v60 }
 0x14a   :  { %1119 = vmatpush.msra.mxu0 %v2731_v50  ;;  %1180 = vmatpush.msra.mxu1 %v2723_v33  ;;  %v1330_v50 = vld [vmem:[%s3521_s9 + $0x68] sm:$0xff] }
 0x14b   :  { %1093 = vmatpush.msrb.mxu3 %v1092_v45  ;;  %v3076_v45 = vand.u32 4294901760, %v1325_v47 }
 0x14c   :  { %1122 = vmatpush.msra.mxu0 %v2734_v31  ;;  %1182 = vmatpush.msra.mxu1 %v2725_v39 }
 0x14d   :  { %1099 = vmatpush.msrb.mxu3 %v1098_v41 }
 0x14e   :  { %1125 = vmatpush.msra.mxu0 %v2737_v51  ;;  %1184 = vmatpush.msra.mxu1 %v2740_v34 }
 0x14f   :  { %1105 = vmatpush.msrb.mxu3 %v1104_v46 }
 0x150   :  { %1128 = vmatpush.msra.mxu0 %v2743_v25  ;;  %1186 = vmatpush.msra.mxu1 %v2794_v54  ;;  %v1329_v25 = vld [vmem:[%s3521_s9 + $0x60] sm:$0xff] }
 0x151   :  { %913 = vmatmul.f32.vlgmr.msrb.gmra.mxu0 %v2824_v60  ;;  %v955_v60 = vld [vmem:[%s3519_s7] sm:$0xff] }
 0x152   :  { %1131 = vmatpush.msra.mxu0 %v2746_v43  ;;  %1188 = vmatpush.msra.mxu1 %v2797_v55  ;;  %v1005_v4 = vand.u32 4294901760, %v955_v60  ;;  %v1328_v43 = vld [vmem:[%s3521_s9 + $0x58] sm:$0xff] }
 0x154   :  { %1134 = vmatpush.msra.mxu0 %v2749_v44  ;;  %1190 = vmatpush.msra.mxu1 %v2799_v63  ;;  %v1107_v5 = vsub.f32 %v955_v60, %v1005_v4  ;;  %v1327_v44 = vld [vmem:[%s3521_s9 + $0x50] sm:$0xff] }
 0x155   :  { %1006 = vmatpush.msrb.mxu2 %v1005_v4 }
 0x156   :  { %1137 = vmatpush.msra.mxu0 %v2758_v59  ;;  %1192 = vmatpush.msra.mxu1 %v2804_v49  ;;  %v1108_v15 = vand.u32 4294901760, %v1107_v5 }
 0x157   :  { %1213 = vmatpush.msra.mxu2 %v1018_v11 }
 0x158   :  { %1140 = vmatpush.msra.mxu0 %v2810_v52  ;;  %1194 = vmatpush.msra.mxu1 %v2819_v37  ;;  %v1109_v32 = vsub.f32 %v1107_v5, %v1108_v15 }
 0x159   :  { %1217 = vmatpush.msra.mxu2 %v1024_v18  ;;  %v3003_v18 = vand.u32 4294901760, %v1329_v25 }
 0x15a   :  { %1143 = vmatpush.msra.mxu0 %v2813_v56  ;;  %1196 = vmatpush.msra.mxu1 %v2835_v14  ;;  %v1110_v16 = vand.u32 4294901760, %v1109_v32  ;;  %v3092_v32 = vsub.f32 %v1325_v47, %v3076_v45 }
 0x15b   :  { %1221 = vmatpush.msra.mxu2 %v1030_v26  ;;  %v3005_v26 = vand.u32 4294901760, %v1328_v43 }
 0x15c   :  { %1146 = vmatpush.msra.mxu0 %v2817_v36  ;;  %1198 = vmatpush.msra.mxu1 %v2839_v42 }
 0x15d   :  { %1225 = vmatpush.msra.mxu2 %v1036_v28  ;;  %1111 = vmatpush.msrb.mxu3 %v1110_v16  ;;  %v3007_v28 = vand.u32 4294901760, %v1327_v44  ;;  %v3028_v52 = vsub.f32 %v1328_v43, %v3005_v26  ;;  %v3095_v16 = vsub.f32 %v1324_v19, %v3079_v17 }
 0x15e   :  { %1149 = vmatpush.msra.mxu0 %v2833_v13  ;;  %1200 = vmatpush.msra.mxu1 %v2870_v38 }
 0x15f   :  { %1280 = vmatpush.msra.mxu3 %v2706_v6  ;;  %1229 = vmatpush.msra.mxu2 %v1042_v58  ;;  %v2048_v6 = vld [vmem:[%s3520_s6] ss:$0 sm:$0xff]  ;;  %v1326_v58 = vld [vmem:[%s3521_s9 + $0x48] sm:$0xff]  ;;  %v3031_v56 = vsub.f32 %v1327_v44, %v3007_v28 }
 0x160   :  { %1152 = vmatpush.msra.mxu0 %v2847_v27  ;;  %1202 = vmatpush.msra.mxu1 %v1005_v4 }
 0x161   :  { %1282 = vmatpush.msra.mxu3 %v2708_v8  ;;  %1233 = vmatpush.msra.mxu2 %v1048_v7  ;;  %v1410_v3 = vand.u32 4294901760, %v3031_v56 }
 0x162   :  { %1155 = vmatpush.msra.mxu0 %v2859_v0 }
 0x163   :  { %1284 = vmatpush.msra.mxu3 %v2710_v9  ;;  %1237 = vmatpush.msra.mxu2 %v1054_v20 }
 0x164   :  { %1158 = vmatpush.msra.mxu0 %v2862_v30 }
 0x165   :  { %1286 = vmatpush.msra.mxu3 %v2721_v24  ;;  %1241 = vmatpush.msra.mxu2 %v1060_v2 }
 0x166   :  { %1161 = vmatpush.msra.mxu0 %v2879_v29 }
 0x167   :  { %1288 = vmatpush.msra.mxu3 %v2723_v33  ;;  %1245 = vmatpush.msra.mxu2 %v1066_v12  ;;  %v1332_v33 = vld [vmem:[%s3521_s9 + $0x78] sm:$0xff] }
 0x168   :  { %1164 = vmatpush.msra.mxu0 %v1107_v5  ;;  %v2988_v31 = vand.u32 4294901760, %v1332_v33 }
 0x169   :  { %1290 = vmatpush.msra.mxu3 %v2725_v39  ;;  %1249 = vmatpush.msra.mxu2 %v1072_v10  ;;  %v1331_v39 = vld [vmem:[%s3521_s9 + $0x70] sm:$0xff] }
 0x16a   :  { %v2990_v51 = vand.u32 4294901760, %v1331_v39  ;;  %v3013_v7 = vsub.f32 %v1332_v33, %v2988_v31  ;;  %1338 = vmatpush.msrb.mxu0 %v2988_v31 }
 0x16b   :  { %1292 = vmatpush.msra.mxu3 %v2740_v34  ;;  %1253 = vmatpush.msra.mxu2 %v1078_v57  ;;  %v2992_v34 = vand.u32 4294901760, %v1330_v50 }
 0x16c   :  { %v3016_v20 = vsub.f32 %v1331_v39, %v2990_v51  ;;  %1340 = vmatpush.msrb.mxu0 %v2990_v51  ;;  %v1422_v39 = vand.u32 4294901760, %v3092_v32 }
 0x16d   :  { %1294 = vmatpush.msra.mxu3 %v2794_v54  ;;  %1257 = vmatpush.msra.mxu2 %v1084_v35  ;;  %v3019_v54 = vsub.f32 %v1330_v50, %v2992_v34  ;;  %v1428_v50 = vand.u32 4294901760, %v3095_v16 }
 0x16e   :  { %v1386_v2 = vand.u32 4294901760, %v3016_v20  ;;  %1342 = vmatpush.msrb.mxu0 %v2992_v34 }
 0x16f   :  { %1296 = vmatpush.msra.mxu3 %v2797_v55  ;;  %1261 = vmatpush.msra.mxu2 %v1090_v21  ;;  %v3022_v55 = vand.u32 4294901760, %v1326_v58  ;;  %v1392_v12 = vand.u32 4294901760, %v3019_v54  ;;  %v1323_v21 = vld [vmem:[%s3521_s9 + $0x30] sm:$0xff] }
 0x170   :  { %v1387_v0 = vsub.f32 %v3016_v20, %v1386_v2  ;;  %1344 = vmatpush.msrb.mxu0 %v3003_v18  ;;  %v3081_v41 = vand.u32 4294901760, %v1323_v21 }
 0x171   :  { %1298 = vmatpush.msra.mxu3 %v2799_v63  ;;  %1265 = vmatpush.msra.mxu2 %v1096_v48  ;;  %v3040_v10 = vsub.f32 %v1326_v58, %v3022_v55  ;;  %v1393_v30 = vsub.f32 %v3019_v54, %v1392_v12  ;;  %v1322_v48 = vld [vmem:[%s3521_s9 + $0x28] sm:$0xff]  ;;  %v1423_v58 = vsub.f32 %v3092_v32, %v1422_v39 }
 0x172   :  { %v1388_v40 = vand.u32 4294901760, %v1387_v0  ;;  %1346 = vmatpush.msrb.mxu0 %v3005_v26  ;;  %v3086_v5 = vand.u32 4294901760, %v1322_v48 }
 0x173   :  { %1300 = vmatpush.msra.mxu3 %v2804_v49  ;;  %1269 = vmatpush.msra.mxu2 %v1102_v61  ;;  %v3025_v49 = vsub.f32 %v1329_v25, %v3003_v18  ;;  %v1416_v61 = vand.u32 4294901760, %v3040_v10  ;;  %v1394_v22 = vand.u32 4294901760, %v1393_v30 }
 0x174   :  { %1348 = vmatpush.msrb.mxu0 %v3007_v28  ;;  %v3110_v25 = vsub.f32 %v1322_v48, %v3086_v5 }
 0x175   :  { %1302 = vmatpush.msra.mxu3 %v2819_v37  ;;  %1273 = vmatpush.msra.mxu2 %v1108_v15  ;;  %v1380_v37 = vand.u32 4294901760, %v3013_v7  ;;  %v1320_v15 = vld [vmem:[%s3521_s9 + $0x18] sm:$0xff]  ;;  %v1417_v33 = vsub.f32 %v3040_v10, %v1416_v61 }
 0x176   :  { %1350 = vmatpush.msrb.mxu0 %v3022_v55  ;;  %v3112_v43 = vand.u32 4294901760, %v1320_v15 }
 0x177   :  { %1304 = vmatpush.msra.mxu3 %v2835_v14  ;;  %v1398_v14 = vand.u32 4294901760, %v3025_v49  ;;  %v1381_v57 = vsub.f32 %v3013_v7, %v1380_v37 }
 0x178   :  { %1352 = vmatpush.msrb.mxu0 %v3076_v45  ;;  %v3129_v0 = vsub.f32 %v1320_v15, %v3112_v43 }
 0x179   :  { %1306 = vmatpush.msra.mxu3 %v2839_v42  ;;  %v1404_v42 = vand.u32 4294901760, %v3028_v52  ;;  %v1382_v1 = vand.u32 4294901760, %v1381_v57  ;;  %v1440_v57 = vand.u32 4294901760, %v3110_v25 }
 0x17a   :  { %1354 = vmatpush.msrb.mxu0 %v3079_v17 }
 0x17b   :  { %1308 = vmatpush.msra.mxu3 %v2870_v38  ;;  %v1399_v38 = vsub.f32 %v3025_v49, %v1398_v14  ;;  %v1405_v53 = vsub.f32 %v3028_v52, %v1404_v42  ;;  %1383 = vmatpush.msrb.mxu1 %v1382_v1  ;;  %v1452_v1 = vand.u32 4294901760, %v3129_v0 }
 0x17c   :  { %1356 = vmatpush.msrb.mxu0 %v3081_v41 }
 0x17d   :  { %1310 = vmatpush.msra.mxu3 %v1005_v4  ;;  %v1400_v60 = vand.u32 4294901760, %v1399_v38  ;;  %v1411_v4 = vsub.f32 %v3031_v56, %v1410_v3  ;;  %1389 = vmatpush.msrb.mxu1 %v1388_v40 }
 0x17e   :  { %1358 = vmatpush.msrb.mxu0 %v3086_v5 }
 0x17f   :  { %1395 = vmatpush.msrb.mxu1 %v1394_v22 }
 0x181   :  { %1401 = vmatpush.msrb.mxu1 %v1400_v60 }
 0x1be   :  { %v752_v8 = vpop.f32.mrf.mxu1 }
 0x1c6   :  { %v651_v9 = vpop.f32.mrf.mxu0  ;;  %v806_v59 = vpop.f32.mrf.mxu2 }
 0x1c7   :  { %v652_v24 = vadd.f32 %v2048_v6, %v651_v9  ;;  %v951_v29 = vpop.f32.mrf.mxu1  ;;  %v3099_v6 = vsub.f32 %v1323_v21, %v3081_v41 }
 0x1c8   :  { %v845_v36 = vpop.f32.mrf.mxu3 }
 0x1c9   :  { %v753_v11 = vadd.f32 %v752_v8, %v652_v24  ;;  %v3101_v8 = vand.u32 4294901760, %v1321_v62  ;;  %v1406_v24 = vand.u32 4294901760, %v1405_v53  ;;  %v1453_v53 = vsub.f32 %v3129_v0, %v1452_v1 }
 0x1cb   :  { %v807_v63 = vadd.f32 %v806_v59, %v753_v11  ;;  %v1412_v11 = vand.u32 4294901760, %v1411_v4  ;;  %v1434_v59 = vand.u32 4294901760, %v3099_v6  ;;  %1407 = vmatpush.msrb.mxu1 %v1406_v24  ;;  %1360 = vmatpush.msrb.mxu0 %v3101_v8  ;;  %v1454_v22 = vand.u32 4294901760, %v1453_v53  ;;  %v1318_v4 = vld [vmem:[%s3521_s9 + $0x8] sm:$0xff]  ;;  %v1317_v24 = vld [vmem:[%s3521_s9] sm:$0xff]  ;;  %v1686_v53 = vld [vmem:[%s3523_s11 + $0x38] sm:$0xff] }
 0x1cd   :  { %v846_v13 = vadd.f32 %v845_v36, %v807_v63  ;;  %v3120_v63 = vsub.f32 %v1321_v62, %v3101_v8  ;;  %1413 = vmatpush.msrb.mxu1 %v1412_v11  ;;  %v1435_v38 = vsub.f32 %v3099_v6, %v1434_v59  ;;  %1362 = vmatpush.msrb.mxu0 %v3112_v43  ;;  %v1367_v11 = vand.u32 4294901760, %v1317_v24 }
 0x1ce   :  { %v914_v27 = vpop.f32.mrf.mxu0 }
 0x1cf   :  { %v915_v35 = vadd.f32 %v914_v27, %v846_v13  ;;  %v1418_v13 = vand.u32 4294901760, %v1417_v33  ;;  %v1429_v27 = vsub.f32 %v3095_v16, %v1428_v50  ;;  %v1446_v47 = vand.u32 4294901760, %v3120_v63 }
 0x1d0   :  { %v1436_v40 = vand.u32 4294901760, %v1435_v38 }
 0x1d1   :  { %v952_v23 = vadd.f32 %v951_v29, %v915_v35  ;;  %v1424_v35 = vand.u32 4294901760, %v1423_v58  ;;  %1419 = vmatpush.msrb.mxu1 %v1418_v13  ;;  %v1430_v21 = vand.u32 4294901760, %v1429_v27  ;;  %v1441_v29 = vsub.f32 %v3110_v25, %v1440_v57 }
 0x1d2   :  { %v1447_v48 = vsub.f32 %v3120_v63, %v1446_v47  ;;  %v1469_v13 = vsub.f32 %v1317_v24, %v1367_v11 }
 0x1d3   :  { %v954_v46 = vmax.f32 %v952_v23, 0.0  ;;  %1425 = vmatpush.msrb.mxu1 %v1424_v35  ;;  %v1442_v23 = vand.u32 4294901760, %v1441_v29 }
 0x1d4   :  { %v1448_v62 = vand.u32 4294901760, %v1447_v48  ;;  %v1470_v35 = vand.u32 4294901760, %v1469_v13 }
 0x1d5   :  { %v1007_v9 = vand.u32 4294901760, %v954_v46  ;;  %1431 = vmatpush.msrb.mxu1 %v1430_v21 }
 0x1d7   :  { %v1008_v44 = vsub.f32 %v954_v46, %v1007_v9  ;;  %1113 = vmatmul.f32.vlgmr.msrb.gmra.mxu3 %v1007_v9  ;;  %1437 = vmatpush.msrb.mxu1 %v1436_v40  ;;  %v1319_v46 = vld [vmem:[%s3521_s9 + $0x10] sm:$0xff] }
 0x1d8   :  { %1534 = vmatpush.msrb.mxu3 %v2988_v31  ;;  %v1363_v60 = vand.u32 4294901760, %v1319_v46 }
 0x1d9   :  { %1167 = vmatmul.f32.vlgmr.msra.gmra.mxu0 %v1008_v44  ;;  %v1009_v36 = vand.u32 4294901760, %v1008_v44  ;;  %1443 = vmatpush.msrb.mxu1 %v1442_v23  ;;  %v1687_v23 = vld [vmem:[%s3523_s11 + $0x40] sm:$0xff] }
 0x1da   :  { %1536 = vmatpush.msrb.mxu3 %v2990_v51  ;;  %v1457_v15 = vsub.f32 %v1319_v46, %v1363_v60  ;;  %1364 = vmatpush.msrb.mxu0 %v1363_v60 }
 0x1db   :  { %1206 = vmatmul.f32.vlgmr.msra.gmra.mxu1 %v1009_v36  ;;  %v1010_v30 = vsub.f32 %v1008_v44, %v1009_v36 }
 0x1dc   :  { %1538 = vmatpush.msrb.mxu3 %v2992_v34  ;;  %1449 = vmatpush.msrb.mxu1 %v1448_v62  ;;  %v1458_v33 = vand.u32 4294901760, %v1457_v15  ;;  %v1685_v62 = vld [vmem:[%s3523_s11 + $0x30] sm:$0xff] }
 0x1dd   :  { %v1011_v19 = vand.u32 4294901760, %v1010_v30 }
 0x1de   :  { %1540 = vmatpush.msrb.mxu3 %v3003_v18  ;;  %1455 = vmatpush.msrb.mxu1 %v1454_v22  ;;  %v1459_v58 = vsub.f32 %v1457_v15, %v1458_v33 }
 0x1df   :  { %1012 = vmatmul.f32.vlgmr.msrb.gmra.mxu2 %v1011_v19  ;;  %1312 = vmatmul.f32.vlgmr.msra.gmra.mxu3 %v1007_v9  ;;  %v1471_v19 = vsub.f32 %v1469_v13, %v1470_v35 }
 0x1e0   :  { %1481 = vmatpush.msrb.mxu2 %v3013_v7  ;;  %1542 = vmatpush.msrb.mxu3 %v3005_v26  ;;  %v1460_v27 = vand.u32 4294901760, %v1459_v58  ;;  %v1692_v7 = vld [vmem:[%s3523_s11 + $0x68] sm:$0xff]  ;;  %v3325_v58 = vand.u32 4294901760, %v1686_v53 }
 0x1e1   :  { %v1472_v21 = vand.u32 4294901760, %v1471_v19 }
 0x1e2   :  { %1484 = vmatpush.msrb.mxu2 %v3016_v20  ;;  %1544 = vmatpush.msrb.mxu3 %v3007_v28 }
 0x1e3   :  { %1461 = vmatpush.msrb.mxu1 %v1460_v27 }
 0x1e4   :  { %1487 = vmatpush.msrb.mxu2 %v3019_v54  ;;  %1546 = vmatpush.msrb.mxu3 %v3022_v55 }
 0x1e6   :  { %1490 = vmatpush.msrb.mxu2 %v3025_v49  ;;  %1548 = vmatpush.msrb.mxu3 %v3076_v45  ;;  %v1691_v49 = vld [vmem:[%s3523_s11 + $0x60] sm:$0xff] }
 0x1e7   :  { %1275 = vmatmul.f32.vlgmr.msra.gmra.mxu2 %v1007_v9  ;;  %v1365_v9 = vand.u32 4294901760, %v1318_v4 }
 0x1e8   :  { %1493 = vmatpush.msrb.mxu2 %v3028_v52  ;;  %1550 = vmatpush.msrb.mxu3 %v3079_v17  ;;  %v1690_v52 = vld [vmem:[%s3523_s11 + $0x58] sm:$0xff] }
 0x1e9   :  { %v1463_v44 = vsub.f32 %v1318_v4, %v1365_v9  ;;  %1366 = vmatpush.msrb.mxu0 %v1365_v9  ;;  %v1684_v4 = vld [vmem:[%s3523_s11 + $0x28] sm:$0xff] }
 0x1ea   :  { %1496 = vmatpush.msrb.mxu2 %v3031_v56  ;;  %1552 = vmatpush.msrb.mxu3 %v3081_v41  ;;  %v1689_v56 = vld [vmem:[%s3523_s11 + $0x50] sm:$0xff] }
 0x1eb   :  { %v1464_v36 = vand.u32 4294901760, %v1463_v44  ;;  %1368 = vmatpush.msrb.mxu0 %v1367_v11 }
 0x1ec   :  { %1499 = vmatpush.msrb.mxu2 %v3040_v10  ;;  %1554 = vmatpush.msrb.mxu3 %v3086_v5 }
 0x1ed   :  { %1575 = vmatpush.msra.mxu0 %v1380_v37  ;;  %v1465_v30 = vsub.f32 %v1463_v44, %v1464_v36 }
 0x1ee   :  { %1502 = vmatpush.msrb.mxu2 %v3092_v32  ;;  %1556 = vmatpush.msrb.mxu3 %v3101_v8 }
 0x1ef   :  { %1579 = vmatpush.msra.mxu0 %v1386_v2  ;;  %v1466_v38 = vand.u32 4294901760, %v1465_v30  ;;  %v3249_v2 = vand.u32 4294901760, %v1691_v49 }
 0x1f0   :  { %1505 = vmatpush.msrb.mxu2 %v3095_v16  ;;  %1558 = vmatpush.msrb.mxu3 %v3112_v43 }
 0x1f1   :  { %1583 = vmatpush.msra.mxu0 %v1392_v12  ;;  %1467 = vmatpush.msrb.mxu1 %v1466_v38  ;;  %v3251_v12 = vand.u32 4294901760, %v1690_v52  ;;  %v1682_v38 = vld [vmem:[%s3523_s11 + $0x18] sm:$0xff] }
 0x1f2   :  { %1508 = vmatpush.msrb.mxu2 %v3099_v6  ;;  %1560 = vmatpush.msrb.mxu3 %v1363_v60 }
 0x1f3   :  { %1587 = vmatpush.msra.mxu0 %v1398_v14  ;;  %1473 = vmatpush.msrb.mxu1 %v1472_v21  ;;  %v3253_v14 = vand.u32 4294901760, %v1689_v56  ;;  %v3274_v32 = vsub.f32 %v1690_v52, %v3251_v12  ;;  %v3341_v21 = vsub.f32 %v1686_v53, %v3325_v58 }
 0x1f4   :  { %1511 = vmatpush.msrb.mxu2 %v3110_v25  ;;  %1562 = vmatpush.msrb.mxu3 %v1365_v9 }
 0x1f5   :  { %1642 = vmatpush.msra.mxu1 %v2988_v31  ;;  %1591 = vmatpush.msra.mxu0 %v1404_v42  ;;  %v2049_v31 = vld [vmem:[%s3522_s8] ss:$0 sm:$0xff]  ;;  %v1688_v42 = vld [vmem:[%s3523_s11 + $0x48] sm:$0xff]  ;;  %v3277_v16 = vsub.f32 %v1689_v56, %v3253_v14  ;;  %v3363_v56 = vand.u32 4294901760, %v1682_v38 }
 0x1f6   :  { %1514 = vmatpush.msrb.mxu2 %v3120_v63  ;;  %1564 = vmatpush.msrb.mxu3 %v1367_v11 }
 0x1f7   :  { %1644 = vmatpush.msra.mxu1 %v2990_v51  ;;  %1595 = vmatpush.msra.mxu0 %v1410_v3  ;;  %v1772_v48 = vand.u32 4294901760, %v3277_v16 }
 0x1f8   :  { %1517 = vmatpush.msrb.mxu2 %v3129_v0 }
 0x1f9   :  { %1646 = vmatpush.msra.mxu1 %v2992_v34  ;;  %1599 = vmatpush.msra.mxu0 %v1416_v61  ;;  %v1773_v30 = vsub.f32 %v3277_v16, %v1772_v48 }
 0x1fa   :  { %1520 = vmatpush.msrb.mxu2 %v1457_v15 }
 0x1fb   :  { %1648 = vmatpush.msra.mxu1 %v3003_v18  ;;  %1603 = vmatpush.msra.mxu0 %v1422_v39 }
 0x1fc   :  { %1523 = vmatpush.msrb.mxu2 %v1463_v44 }
 0x1fd   :  { %1650 = vmatpush.msra.mxu1 %v3005_v26  ;;  %1607 = vmatpush.msra.mxu0 %v1428_v50  ;;  %v1694_v26 = vld [vmem:[%s3523_s11 + $0x78] sm:$0xff] }
 0x1fe   :  { %1526 = vmatpush.msrb.mxu2 %v1469_v13  ;;  %v3234_v20 = vand.u32 4294901760, %v1694_v26 }
 0x1ff   :  { %1652 = vmatpush.msra.mxu1 %v3007_v28  ;;  %1611 = vmatpush.msra.mxu0 %v1434_v59  ;;  %v1693_v28 = vld [vmem:[%s3523_s11 + $0x70] sm:$0xff]  ;;  %v1766_v59 = vand.u32 4294901760, %v3274_v32 }
 0x200   :  { %v3236_v54 = vand.u32 4294901760, %v1693_v28  ;;  %v3259_v3 = vsub.f32 %v1694_v26, %v3234_v20  ;;  %1700 = vmatpush.msra.mxu2 %v3234_v20 }
 0x201   :  { %1654 = vmatpush.msra.mxu1 %v3022_v55  ;;  %1615 = vmatpush.msra.mxu0 %v1440_v57  ;;  %v3238_v55 = vand.u32 4294901760, %v1692_v7 }
 0x202   :  { %v3262_v61 = vsub.f32 %v1693_v28, %v3236_v54  ;;  %1702 = vmatpush.msra.mxu2 %v3236_v54 }
 0x203   :  { %1656 = vmatpush.msra.mxu1 %v3076_v45  ;;  %1619 = vmatpush.msra.mxu0 %v1446_v47  ;;  %v3265_v45 = vsub.f32 %v1692_v7, %v3238_v55 }
 0x204   :  { %v1748_v39 = vand.u32 4294901760, %v3262_v61  ;;  %1704 = vmatpush.msra.mxu2 %v3238_v55 }
 0x205   :  { %1658 = vmatpush.msra.mxu1 %v3079_v17  ;;  %1623 = vmatpush.msra.mxu0 %v1452_v1  ;;  %v3268_v17 = vand.u32 4294901760, %v1688_v42  ;;  %v1754_v50 = vand.u32 4294901760, %v3265_v45 }
 0x206   :  { %v1749_v47 = vsub.f32 %v3262_v61, %v1748_v39  ;;  %1706 = vmatpush.msra.mxu2 %v3249_v2 }
 0x207   :  { %1660 = vmatpush.msra.mxu1 %v3081_v41  ;;  %1627 = vmatpush.msra.mxu0 %v1458_v33  ;;  %v3286_v63 = vsub.f32 %v1688_v42, %v3268_v17  ;;  %v1755_v29 = vsub.f32 %v3265_v45, %v1754_v50  ;;  %v1683_v33 = vld [vmem:[%s3523_s11 + $0x20] sm:$0xff] }
 0x208   :  { %1708 = vmatpush.msra.mxu2 %v3251_v12 }
 0x209   :  { %1662 = vmatpush.msra.mxu1 %v3086_v5  ;;  %1631 = vmatpush.msra.mxu0 %v1464_v36  ;;  %v3271_v5 = vsub.f32 %v1691_v49, %v3249_v2  ;;  %v1778_v24 = vand.u32 4294901760, %v3286_v63  ;;  %v1756_v44 = vand.u32 4294901760, %v1755_v29  ;;  %v3327_v36 = vand.u32 4294901760, %v1685_v62 }
 0x20a   :  { %1710 = vmatpush.msra.mxu2 %v3253_v14  ;;  %v1790_v49 = vand.u32 4294901760, %v3341_v21 }
 0x20b   :  { %1664 = vmatpush.msra.mxu1 %v3101_v8  ;;  %1635 = vmatpush.msra.mxu0 %v1470_v35  ;;  %v1742_v8 = vand.u32 4294901760, %v3259_v3  ;;  %v3332_v35 = vand.u32 4294901760, %v1684_v4  ;;  %v1779_v28 = vsub.f32 %v3286_v63, %v1778_v24 }
 0x20c   :  { %1712 = vmatpush.msra.mxu2 %v3268_v17  ;;  %v1791_v29 = vsub.f32 %v3341_v21, %v1790_v49 }
 0x20d   :  { %1666 = vmatpush.msra.mxu1 %v3112_v43  ;;  %v1760_v43 = vand.u32 4294901760, %v3271_v5  ;;  %v1743_v0 = vsub.f32 %v3259_v3, %v1742_v8  ;;  %v3361_v52 = vsub.f32 %v1684_v4, %v3332_v35 }
 0x20f   :  { %1668 = vmatpush.msra.mxu1 %v1363_v60  ;;  %v1761_v40 = vsub.f32 %v3271_v5, %v1760_v43  ;;  %v1744_v46 = vand.u32 4294901760, %v1743_v0  ;;  %v1750_v60 = vand.u32 4294901760, %v1749_v47  ;;  %v1680_v0 = vld [vmem:[%s3523_s11 + $0x8] sm:$0xff]  ;;  %v1780_v47 = vand.u32 4294901760, %v1779_v28 }
 0x211   :  { %1670 = vmatpush.msra.mxu1 %v1365_v9  ;;  %v1767_v9 = vsub.f32 %v3274_v32, %v1766_v59  ;;  %1745 = vmatpush.msra.mxu3 %v1744_v46  ;;  %v1762_v27 = vand.u32 4294901760, %v1761_v40  ;;  %v3387_v40 = vsub.f32 %v1682_v38, %v3363_v56 }
 0x213   :  { %1672 = vmatpush.msra.mxu1 %v1367_v11  ;;  %v3322_v11 = vand.u32 4294901760, %v1687_v23  ;;  %1751 = vmatpush.msra.mxu3 %v1750_v60  ;;  %v1768_v26 = vand.u32 4294901760, %v1767_v9  ;;  %v3398_v60 = vand.u32 4294901760, %v1680_v0 }
 0x215   :  { %v3338_v19 = vsub.f32 %v1687_v23, %v3322_v11  ;;  %1757 = vmatpush.msra.mxu3 %v1756_v44  ;;  %1714 = vmatpush.msra.mxu2 %v3322_v11  ;;  %v3407_v44 = vsub.f32 %v1680_v0, %v3398_v60 }
 0x217   :  { %v1784_v7 = vand.u32 4294901760, %v3338_v19  ;;  %1763 = vmatpush.msra.mxu3 %v1762_v27  ;;  %1716 = vmatpush.msra.mxu2 %v3325_v58 }
 0x219   :  { %1769 = vmatpush.msra.mxu3 %v1768_v26  ;;  %1718 = vmatpush.msra.mxu2 %v3327_v36  ;;  %v1826_v26 = vand.u32 4294901760, %v3407_v44 }
 0x21b   :  { %1720 = vmatpush.msra.mxu2 %v3332_v35 }
 0x256   :  { %v1168_v10 = vpop.f32.mrf.mxu0 }
 0x258   :  { %v1207_v6 = vpop.f32.mrf.mxu1 }
 0x25a   :  { %v1114_v51 = vpop.f32.mrf.mxu3 }
 0x262   :  { %v1013_v34 = vpop.f32.mrf.mxu2  ;;  %v1313_v22 = vpop.f32.mrf.mxu3 }
 0x263   :  { %v1014_v18 = vadd.f32 %v2049_v31, %v1013_v34  ;;  %v3345_v31 = vsub.f32 %v1685_v62, %v3327_v36  ;;  %v1681_v34 = vld [vmem:[%s3523_s11 + $0x10] sm:$0xff] }
 0x264   :  { %v3367_v42 = vand.u32 4294901760, %v1681_v34 }
 0x265   :  { %v1115_v37 = vadd.f32 %v1114_v51, %v1014_v18  ;;  %v3347_v51 = vand.u32 4294901760, %v1683_v33 }
 0x266   :  { %v3390_v53 = vsub.f32 %v1681_v34, %v3367_v42 }
 0x267   :  { %v1169_v41 = vadd.f32 %v1168_v10, %v1115_v37  ;;  %v1774_v10 = vand.u32 4294901760, %v1773_v30  ;;  %1722 = vmatpush.msra.mxu2 %v3347_v51 }
 0x268   :  { %v1820_v30 = vand.u32 4294901760, %v3390_v53 }
 0x269   :  { %v1208_v25 = vadd.f32 %v1207_v6, %v1169_v41  ;;  %v1785_v41 = vsub.f32 %v3338_v19, %v1784_v7  ;;  %v1796_v6 = vand.u32 4294901760, %v3345_v31  ;;  %1775 = vmatpush.msra.mxu3 %v1774_v10  ;;  %1724 = vmatpush.msra.mxu2 %v3363_v56 }
 0x26a   :  { %v1276_v57 = vpop.f32.mrf.mxu2 }
 0x26b   :  { %v1277_v1 = vadd.f32 %v1276_v57, %v1208_v25  ;;  %v3375_v25 = vsub.f32 %v1683_v33, %v3347_v51  ;;  %v1786_v62 = vand.u32 4294901760, %v1785_v41  ;;  %1781 = vmatpush.msra.mxu3 %v1780_v47  ;;  %v1814_v33 = vand.u32 4294901760, %v3387_v40  ;;  %1726 = vmatpush.msra.mxu2 %v3367_v42 }
 0x26c   :  { %v1827_v41 = vsub.f32 %v3407_v44, %v1826_v26 }
 0x26d   :  { %v1314_v15 = vadd.f32 %v1313_v22, %v1277_v1  ;;  %v1802_v1 = vand.u32 4294901760, %v3361_v52  ;;  %v1797_v22 = vsub.f32 %v3345_v31, %v1796_v6  ;;  %v1808_v46 = vand.u32 4294901760, %v3375_v25  ;;  %1787 = vmatpush.msra.mxu3 %v1786_v62  ;;  %1728 = vmatpush.msra.mxu2 %v3398_v60 }
 0x26e   :  { %v1815_v34 = vsub.f32 %v3387_v40, %v1814_v33  ;;  %v1828_v0 = vand.u32 4294901760, %v1827_v41 }
 0x26f   :  { %v1316_v13 = vmax.f32 %v1314_v15, 0.0  ;;  %v1792_v15 = vand.u32 4294901760, %v1791_v29  ;;  %v1803_v9 = vsub.f32 %v3361_v52, %v1802_v1  ;;  %v1809_v27 = vsub.f32 %v3375_v25, %v1808_v46 }
 0x270   :  { %v1816_v10 = vand.u32 4294901760, %v1815_v34 }
 0x271   :  { %v3352_v18 = vand.u32 4294901760, %v1316_v13  ;;  %1793 = vmatpush.msra.mxu3 %v1792_v15  ;;  %v1804_v38 = vand.u32 4294901760, %v1803_v9  ;;  %v1810_v28 = vand.u32 4294901760, %v1809_v27 }
 0x273   :  { %v1370_v37 = vsub.f32 %v1316_v13, %v3352_v18  ;;  %1475 = vmatmul.f32.vlgmr.msrb.gmra.mxu1 %v3352_v18  ;;  %v1798_v13 = vand.u32 4294901760, %v1797_v22 }
 0x274   :  { %1896 = vmatpush.msrb.mxu1 %v3234_v20 }
 0x275   :  { %1529 = vmatmul.f32.vlgmr.msrb.gmra.mxu2 %v1370_v37  ;;  %v1371_v57 = vand.u32 4294901760, %v1370_v37  ;;  %1799 = vmatpush.msra.mxu3 %v1798_v13 }
 0x276   :  { %1898 = vmatpush.msrb.mxu1 %v3236_v54 }
 0x277   :  { %1568 = vmatmul.f32.vlgmr.msrb.gmra.mxu3 %v1371_v57  ;;  %v1372_v23 = vsub.f32 %v1370_v37, %v1371_v57  ;;  %v1821_v37 = vsub.f32 %v3390_v53, %v1820_v30 }
 0x278   :  { %1900 = vmatpush.msrb.mxu1 %v3238_v55  ;;  %1805 = vmatpush.msra.mxu3 %v1804_v38 }
 0x279   :  { %v1373_v4 = vand.u32 4294901760, %v1372_v23  ;;  %v1822_v57 = vand.u32 4294901760, %v1821_v37 }
 0x27a   :  { %1902 = vmatpush.msrb.mxu1 %v3249_v2  ;;  %1811 = vmatpush.msra.mxu3 %v1810_v28 }
 0x27b   :  { %1374 = vmatmul.f32.vlgmr.msrb.gmra.mxu0 %v1373_v4  ;;  %1674 = vmatmul.f32.vlgmr.msra.gmra.mxu1 %v3352_v18 }
 0x27c   :  { %1843 = vmatpush.msrb.mxu0 %v3259_v3  ;;  %1904 = vmatpush.msrb.mxu1 %v3251_v12 }
 0x27d   :  { %1817 = vmatpush.msra.mxu3 %v1816_v10 }
 0x27e   :  { %1846 = vmatpush.msrb.mxu0 %v3262_v61  ;;  %1906 = vmatpush.msrb.mxu1 %v3253_v14 }
 0x27f   :  { %1823 = vmatpush.msra.mxu3 %v1822_v57 }
 0x280   :  { %1849 = vmatpush.msrb.mxu0 %v3265_v45  ;;  %1908 = vmatpush.msrb.mxu1 %v3268_v17 }
 0x281   :  { %1829 = vmatpush.msra.mxu3 %v1828_v0 }
 0x282   :  { %1852 = vmatpush.msrb.mxu0 %v3271_v5  ;;  %1910 = vmatpush.msrb.mxu1 %v3322_v11 }
 0x283   :  { %1637 = vmatmul.f32.vlgmr.msra.gmra.mxu0 %v3352_v18  ;;  %v1679_v18 = vld [vmem:[%s3523_s11] sm:$0xff] }
 0x284   :  { %1855 = vmatpush.msrb.mxu0 %v3274_v32  ;;  %1912 = vmatpush.msrb.mxu1 %v3325_v58  ;;  %v1729_v47 = vand.u32 4294901760, %v1679_v18 }
 0x286   :  { %1858 = vmatpush.msrb.mxu0 %v3277_v16  ;;  %1914 = vmatpush.msrb.mxu1 %v3327_v36  ;;  %v1831_v29 = vsub.f32 %v1679_v18, %v1729_v47 }
 0x287   :  { %1730 = vmatpush.msra.mxu2 %v1729_v47 }
 0x288   :  { %1861 = vmatpush.msrb.mxu0 %v3286_v63  ;;  %1916 = vmatpush.msrb.mxu1 %v3332_v35  ;;  %v1832_v23 = vand.u32 4294901760, %v1831_v29 }
 0x289   :  { %1937 = vmatpush.msrb.mxu2 %v1742_v8 }
 0x28a   :  { %1864 = vmatpush.msrb.mxu0 %v3338_v19  ;;  %1918 = vmatpush.msrb.mxu1 %v3347_v51  ;;  %v1833_v62 = vsub.f32 %v1831_v29, %v1832_v23 }
 0x28b   :  { %1941 = vmatpush.msrb.mxu2 %v1748_v39 }
 0x28c   :  { %1867 = vmatpush.msrb.mxu0 %v3341_v21  ;;  %1920 = vmatpush.msrb.mxu1 %v3363_v56  ;;  %v1834_v22 = vand.u32 4294901760, %v1833_v62 }
 0x28d   :  { %1945 = vmatpush.msrb.mxu2 %v1754_v50 }
 0x28e   :  { %1870 = vmatpush.msrb.mxu0 %v3345_v31  ;;  %1922 = vmatpush.msrb.mxu1 %v3367_v42 }
 0x28f   :  { %1949 = vmatpush.msrb.mxu2 %v1760_v43  ;;  %1835 = vmatpush.msra.mxu3 %v1834_v22 }
 0x290   :  { %1873 = vmatpush.msrb.mxu0 %v3361_v52  ;;  %1924 = vmatpush.msrb.mxu1 %v3398_v60 }
 0x291   :  { %2004 = vmatpush.msrb.mxu3 %v3234_v20  ;;  %1953 = vmatpush.msrb.mxu2 %v1766_v59  ;;  %v2050_v20 = vld [vmem:[%s3524_s10] ss:$0 sm:$0xff] }
 0x292   :  { %1876 = vmatpush.msrb.mxu0 %v3375_v25  ;;  %1926 = vmatpush.msrb.mxu1 %v1729_v47 }
 0x293   :  { %2006 = vmatpush.msrb.mxu3 %v3236_v54  ;;  %1957 = vmatpush.msrb.mxu2 %v1772_v48  ;;  %v18_v48 = vstv %s3525_s12 }
 0x294   :  { %1879 = vmatpush.msrb.mxu0 %v3387_v40  ;;  %19 = vst [vmem:[#allocation2] sm:$0x1] %v18_v48 }
 0x295   :  { %2008 = vmatpush.msrb.mxu3 %v3238_v55  ;;  %1961 = vmatpush.msrb.mxu2 %v1778_v24 }
 0x296   :  { %1882 = vmatpush.msrb.mxu0 %v3390_v53 }
 0x297   :  { %2010 = vmatpush.msrb.mxu3 %v3249_v2  ;;  %1965 = vmatpush.msrb.mxu2 %v1784_v7 }
 0x298   :  { %1885 = vmatpush.msrb.mxu0 %v3407_v44 }
 0x299   :  { %2012 = vmatpush.msrb.mxu3 %v3251_v12  ;;  %1969 = vmatpush.msrb.mxu2 %v1790_v49 }
 0x29a   :  { %1888 = vmatpush.msrb.mxu0 %v1831_v29 }
 0x29b   :  { %2014 = vmatpush.msrb.mxu3 %v3253_v14  ;;  %1973 = vmatpush.msrb.mxu2 %v1796_v6  ;;  %v2051_v24 = vld [vmem:[#allocation2] ss:$0 sm:$0xff] }
 0x29d   :  { %2016 = vmatpush.msrb.mxu3 %v3268_v17  ;;  %1977 = vmatpush.msrb.mxu2 %v1802_v1 }
 0x29f   :  { %2018 = vmatpush.msrb.mxu3 %v3322_v11  ;;  %1981 = vmatpush.msrb.mxu2 %v1808_v46 }
 0x2a1   :  { %2020 = vmatpush.msrb.mxu3 %v3325_v58  ;;  %1985 = vmatpush.msrb.mxu2 %v1814_v33 }
 0x2a3   :  { %2022 = vmatpush.msrb.mxu3 %v3327_v36  ;;  %1989 = vmatpush.msrb.mxu2 %v1820_v30 }
 0x2a5   :  { %2024 = vmatpush.msrb.mxu3 %v3332_v35  ;;  %1993 = vmatpush.msrb.mxu2 %v1826_v26 }
 0x2a7   :  { %2026 = vmatpush.msrb.mxu3 %v3347_v51  ;;  %1997 = vmatpush.msrb.mxu2 %v1832_v23 }
 0x2a9   :  { %2028 = vmatpush.msrb.mxu3 %v3363_v56 }
 0x2ab   :  { %2030 = vmatpush.msrb.mxu3 %v3367_v42 }
 0x2ad   :  { %2032 = vmatpush.msrb.mxu3 %v3398_v60 }
 0x2af   :  { %2034 = vmatpush.msrb.mxu3 %v1729_v47 }
 0x2f0   :  { %v1476_v54 = vpop.f32.mrf.mxu1 }
 0x2f8   :  { %v1375_v55 = vpop.f32.mrf.mxu0  ;;  %v1530_v14 = vpop.f32.mrf.mxu2 }
 0x2f9   :  { %v1376_v2 = vadd.f32 %v2050_v20, %v1375_v55  ;;  %v1675_v32 = vpop.f32.mrf.mxu1 }
 0x2fa   :  { %v1569_v61 = vpop.f32.mrf.mxu3 }
 0x2fb   :  { %v1477_v12 = vadd.f32 %v1476_v54, %v1376_v2 }
 0x2fd   :  { %v1531_v3 = vadd.f32 %v1530_v14, %v1477_v12 }
 0x2ff   :  { %v1570_v45 = vadd.f32 %v1569_v61, %v1531_v3 }
 0x300   :  { %v1638_v17 = vpop.f32.mrf.mxu0 }
 0x301   :  { %v1639_v5 = vadd.f32 %v1638_v17, %v1570_v45 }
 0x303   :  { %v1676_v16 = vadd.f32 %v1675_v32, %v1639_v5 }
 0x305   :  { %v1678_v8 = vmax.f32 %v1676_v16, 0.0 }
 0x307   :  { %v1731_v39 = vand.u32 4294901760, %v1678_v8 }
 0x309   :  { %v1732_v50 = vsub.f32 %v1678_v8, %v1731_v39  ;;  %1837 = vmatmul.f32.vlgmr.msra.gmra.mxu3 %v1731_v39 }
 0x30b   :  { %1891 = vmatmul.f32.vlgmr.msrb.gmra.mxu0 %v1732_v50  ;;  %v1733_v43 = vand.u32 4294901760, %v1732_v50 }
 0x30d   :  { %1930 = vmatmul.f32.vlgmr.msrb.gmra.mxu1 %v1733_v43  ;;  %v1734_v59 = vsub.f32 %v1732_v50, %v1733_v43 }
 0x30f   :  { %v1735_v63 = vand.u32 4294901760, %v1734_v59 }
 0x311   :  { %1736 = vmatmul.f32.vlgmr.msra.gmra.mxu2 %v1735_v63  ;;  %2036 = vmatmul.f32.vlgmr.msrb.gmra.mxu3 %v1731_v39 }
 0x319   :  { %1999 = vmatmul.f32.vlgmr.msrb.gmra.mxu2 %v1731_v39 }
 0x388   :  { %v1892_v19 = vpop.f32.mrf.mxu0 }
 0x38a   :  { %v1931_v31 = vpop.f32.mrf.mxu1 }
 0x38c   :  { %v1838_v11 = vpop.f32.mrf.mxu3 }
 0x394   :  { %v1737_v58 = vpop.f32.mrf.mxu2  ;;  %v2037_v52 = vpop.f32.mrf.mxu3 }
 0x395   :  { %v1738_v36 = vadd.f32 %v2051_v24, %v1737_v58 }
 0x397   :  { %v1839_v35 = vadd.f32 %v1838_v11, %v1738_v36 }
 0x399   :  { %v1893_v21 = vadd.f32 %v1892_v19, %v1839_v35 }
 0x39b   :  { %v1932_v51 = vadd.f32 %v1931_v31, %v1893_v21 }
 0x39c   :  { %v2000_v7 = vpop.f32.mrf.mxu2 }
 0x39d   :  { %v2001_v49 = vadd.f32 %v2000_v7, %v1932_v51 }
 0x39f   :  { %v2038_v56 = vadd.f32 %v2037_v52, %v2001_v49 }
 0x3a1   :  { %2041 = vst.msk [vmem:[%s3526_s13] sm:$0xff] %vm2040_vm1, %v2038_v56 }

</bundles_post_ra>
